<compile_context>
chip_gen: v5e
topology: v5e:2x2
jax: 0.10.0
libtpu: 0.0.40
codegen_flags: <defaults>
</compile_context>

<pallas_src>
import functools

import jax
import jax.numpy as jnp
import numpy as np
from jax import lax
from jax.experimental import pallas as pl
from jax.experimental.pallas import tpu as pltpu

C_FEATURES = 256
BN_EPS = 1e-5
_MAX_TILE_ROWS = 1024  # (1024, 256) f32 = 1 MiB per streaming-stats buffer


def _vmem_limit_bytes(block_bytes: int) -> int:
    """VMEM cap derived from the actual tile footprint (+slack), floored at 16 MiB.
    Surfacing an over-budget tiling at compile time (v7x: 64 MiB physical) is intended."""
    return int(max(2 * block_bytes + (8 << 20), 16 << 20))


# -----------------------------------------------------------------------------
# Kernel 1: streaming BatchNorm statistics -> folded per-channel coefficients.
#   coefs (2, C): row0 = a_c = gamma_c * rstd_c, row1 = b_c = beta_c - mean_c * a_c
# Pure streaming reduction ("arbitrary" axis); sums accumulate in aligned (8, C)
# scratch so the hot loop is full-sublane vadds only.
# -----------------------------------------------------------------------------
def _bn_stats_kernel(x_ref, gamma_ref, beta_ref, coefs_ref, sum_sc, sq_sc,
                     *, n_rows, tile_rows, needs_mask):
    i = pl.program_id(0)

    @pl.when(i == 0)
    def _init():
        sum_sc[...] = jnp.zeros_like(sum_sc)
        sq_sc[...] = jnp.zeros_like(sq_sc)

    x = x_ref[...]
    if needs_mask:
        # Tail tile: rows past n_rows are unspecified -> mask them to zero (zeros are
        # neutral for sum / sumsq since we divide by the true n_rows at finalize).
        rows = lax.broadcasted_iota(jnp.int32, (tile_rows, 1), 0) + i * tile_rows
        x = jnp.where(rows < n_rows, x, 0.0)

    if tile_rows % 8 == 0:
        # Group rows into sublane-aligned (8, C) partials -> plain full-tile vadds.
        xg = x.reshape(tile_rows // 8, 8, x.shape[1])
        sum_sc[...] = sum_sc[...] + jnp.sum(xg, axis=0)
        sq_sc[...] = sq_sc[...] + jnp.sum(xg * xg, axis=0)
    else:
        sum_sc[0:1, :] = sum_sc[0:1, :] + jnp.sum(x, axis=0, keepdims=True)
        sq_sc[0:1, :] = sq_sc[0:1, :] + jnp.sum(x * x, axis=0, keepdims=True)

    @pl.when(i == pl.num_programs(0) - 1)
    def _finalize():
        inv_n = 1.0 / float(n_rows)
        mean = jnp.sum(sum_sc[...], axis=0, keepdims=True) * inv_n
        var = jnp.sum(sq_sc[...], axis=0, keepdims=True) * inv_n - mean * mean
        # TODO(synk): E[x^2]-mean^2 can cancel for huge N / large means; Welford-style
        # per-tile merging would match PyTorch's two-pass BN more closely.
        var = jnp.maximum(var, 0.0)
        a = gamma_ref[...] * lax.rsqrt(var + BN_EPS)
        coefs_ref[0:1, :] = a
        coefs_ref[1:2, :] = beta_ref[...] - mean * a


def batch_norm_coefs(x_blc, gamma_r, beta_r):
    """Folded BN coefficients over the flattened (B*L, C) channel-last activations."""
    B, L, C = x_blc.shape
    n_rows = B * L
    x_flat = x_blc.reshape(n_rows, C)                   # free reshape (collapse leading dims)
    tile = n_rows if n_rows <= _MAX_TILE_ROWS else _MAX_TILE_ROWS
    n_tiles = pl.cdiv(n_rows, tile)
    needs_mask = (n_rows % tile) != 0

    block_bytes = 4 * (2 * tile * C + 2 * C + 2 * 8 * C + 2 * C)

    return pl.pallas_call(
        functools.partial(_bn_stats_kernel, n_rows=n_rows, tile_rows=tile,
                          needs_mask=needs_mask),
        out_shape=jax.ShapeDtypeStruct((2, C), jnp.float32),
        grid_spec=pltpu.PrefetchScalarGridSpec(
            num_scalar_prefetch=0,
            grid=(n_tiles,),
            in_specs=[
                pl.BlockSpec((tile, C), lambda i: (i, 0)),   # x row tile (streamed)
                pl.BlockSpec((1, C), lambda i: (0, 0)),      # gamma (resident)
                pl.BlockSpec((1, C), lambda i: (0, 0)),      # beta  (resident)
            ],
            out_specs=pl.BlockSpec((2, C), lambda i: (0, 0)),
            scratch_shapes=[pltpu.VMEM((8, C), jnp.float32),
                            pltpu.VMEM((8, C), jnp.float32)],
        ),
        compiler_params=pltpu.CompilerParams(
            dimension_semantics=("arbitrary",),              # resident accumulator axis
            vmem_limit_bytes=_vmem_limit_bytes(block_bytes)),
    )(x_flat, gamma_r, beta_r)


# -----------------------------------------------------------------------------
# Kernel 2: fused CBN-apply + ReLU + dilated 'same' Conv1d (+ optional residual).
#   y    = relu(scale_row * (x*a_c + b_c) + shift_row)      (never leaves VMEM)
#   out  = im2col(y_padded) @ w_flat + bias [+ skip]
# Grid over batch ("parallel" -> shards across v7x's 2 TensorCores).
# -----------------------------------------------------------------------------
def _cbn_relu_conv_body(x_ref, coefs_ref, mods_ref, w_ref, pad_ref,
                        dilation, lo, hi, n_taps):
    L = x_ref.shape[1]
    C = x_ref.shape[2]
    a = coefs_ref[0:1, :]                      # (1, C)  sublane-broadcast
    b = coefs_ref[1:2, :]
    m = mods_ref[0]                            # (2S, 1) with S == L
    scale = m[0:L, :]                          # (L, 1)  lane-broadcast over C
    shift = m[L:2 * L, :]
    # Fused CBN normalize + conditional modulation + ReLU.
    y = jnp.maximum(scale * (x_ref[0] * a + b) + shift, 0.0)
    # In-kernel 'same' padding: zero border rows of the VMEM scratch, write interior.
    if lo > 0:
        pad_ref[0:lo, :] = jnp.zeros((lo, C), jnp.float32)
    if hi > 0:
        pad_ref[lo + L:lo + L + hi, :] = jnp.zeros((hi, C), jnp.float32)
    pad_ref[lo:lo + L, :] = y
    # im2col: one (L, K*C) @ (K*C, C) MXU contraction (weights stay resident).
    cols = [pad_ref[k * dilation:k * dilation + L, :] for k in range(n_taps)]
    lhs = cols[0] if n_taps == 1 else jnp.concatenate(cols, axis=1)
    # TODO(synk): cast lhs / w to bf16 (f32 accumulation) if the accuracy budget allows.
    return jnp.dot(lhs, w_ref[...], preferred_element_type=jnp.float32)


def _cbn_relu_conv_kernel(x_ref, coefs_ref, mods_ref, w_ref, b_ref, o_ref, pad_ref,
                          *, dilation, lo, hi, n_taps):
    conv = _cbn_relu_conv_body(x_ref, coefs_ref, mods_ref, w_ref, pad_ref,
                               dilation, lo, hi, n_taps)
    o_ref[0] = conv + b_ref[...]


def _cbn_relu_conv_res_kernel(x_ref, coefs_ref, mods_ref, w_ref, b_ref, skip_ref,
                              o_ref, pad_ref, *, dilation, lo, hi, n_taps):
    conv = _cbn_relu_conv_body(x_ref, coefs_ref, mods_ref, w_ref, pad_ref,
                               dilation, lo, hi, n_taps)
    o_ref[0] = conv + b_ref[...] + skip_ref[0]


def cbn_relu_conv(x_blc, coefs, mods_cols, w_flat, bias_r, dilation, skip_blc=None):
    """relu(CBN(x)) followed by dilated 'same' Conv1d, all fused, channel-last.
    x_blc: (B, L, C); coefs: (2, C); mods_cols: (B, 2S, 1) with S == L;
    w_flat: (K*C, C_out); bias_r: (1, C_out). Optional fused residual skip_blc."""
    B, L, C = x_blc.shape
    two_s = mods_cols.shape[1]
    assert two_s == 2 * L, "ConditionalBatchNorm requires seq_len == L"
    kc, c_out = w_flat.shape
    n_taps = kc // C
    total = dilation * (n_taps - 1)
    lo = total // 2
    hi = total - lo                                   # matches PyTorch 'same'

    in_specs = [
        pl.BlockSpec((1, L, C), lambda bi: (bi, 0, 0)),        # x (pre-CBN activation)
        pl.BlockSpec((2, C), lambda bi: (0, 0)),               # BN coefs (resident)
        pl.BlockSpec((1, two_s, 1), lambda bi: (bi, 0, 0)),    # per-batch scale/shift cols
        pl.BlockSpec((kc, c_out), lambda bi: (0, 0)),          # conv weight (resident)
        pl.BlockSpec((1, c_out), lambda bi: (0, 0)),           # bias (resident)
    ]
    args = [x_blc, coefs, mods_cols, w_flat, bias_r]
    if skip_blc is None:
        kernel = functools.partial(_cbn_relu_conv_kernel, dilation=dilation,
                                   lo=lo, hi=hi, n_taps=n_taps)
    else:
        kernel = functools.partial(_cbn_relu_conv_res_kernel, dilation=dilation,
                                   lo=lo, hi=hi, n_taps=n_taps)
        in_specs.append(pl.BlockSpec((1, L, c_out), lambda bi: (bi, 0, 0)))
        args.append(skip_blc)

    # TODO(synk): for very long sequences (v7x: 64 MiB VMEM) tile along L with a halo and
    # grid over (B, L-tiles) to fill the MXU M dim and feed both TensorCores more grid.
    block_bytes = 4 * (
        2 * L * C + 2 * L * c_out                              # x in / out, double-buffered
        + 2 * C + two_s + kc * c_out + c_out                   # resident coefs/mods/w/bias
        + (L + total) * C                                      # padded VMEM scratch
        + (2 * L * c_out if skip_blc is not None else 0))

    return pl.pallas_call(
        kernel,
        out_shape=jax.ShapeDtypeStruct((B, L, c_out), jnp.float32),
        grid_spec=pltpu.PrefetchScalarGridSpec(
            num_scalar_prefetch=0,
            grid=(B,),
            in_specs=in_specs,
            out_specs=pl.BlockSpec((1, L, c_out), lambda bi: (bi, 0, 0)),
            scratch_shapes=[pltpu.VMEM((L + total, C), jnp.float32)],
        ),
        compiler_params=pltpu.CompilerParams(
            dimension_semantics=("parallel",),
            vmem_limit_bytes=_vmem_limit_bytes(block_bytes)),
    )(*args)


# -----------------------------------------------------------------------------
# UnalignedBlock forward (PyTorch semantics), channel-last inside the block.
# -----------------------------------------------------------------------------
@functools.partial(jax.jit, static_argnames=("dilations",))
def unaligned_block_forward(x_ncl, z, params, *, dilations):
    """x_ncl: (B, C, L) like the torch NCL input; z: (B, C). Returns (B, C, L)."""
    x = jnp.transpose(x_ncl, (0, 2, 1))               # -> (B, L, C) once at entry
    # TODO(synk): fuse the entry/exit transposes into the adjacent kernels (XLU) and the
    # CBN2 stats pass into conv1's epilogue to drop two more HBM traversals.

    # Tiny fused scale/shift Linear (the "+1" of scale is folded into the bias).
    mods = (jnp.dot(z, params["w_fused_t"], precision=lax.Precision.HIGHEST)
            + params["b_fused"])                      # (B, 2S) = [scale | shift]
    mods_cols = mods[:, :, None]                      # (B, 2S, 1) per-batch column block

    coefs1 = batch_norm_coefs(x, params["gamma_r"], params["beta_r"])
    h = cbn_relu_conv(x, coefs1, mods_cols, params["w1_flat"], params["b1_r"],
                      dilations[0])                   # cbn + relu_1 + conv1 fused
    coefs2 = batch_norm_coefs(h, params["gamma_r"], params["beta_r"])
    out = cbn_relu_conv(h, coefs2, mods_cols, params["w2_flat"], params["b2_r"],
                        dilations[1], skip_blc=x)     # cbn + relu_2 + conv2 + residual
    return jnp.transpose(out, (0, 2, 1))              # back to NCL once at exit


# ---------------- parameter setup (plain JAX glue, done once) ----------------
def _spectral_normalize(w, n_iters=50, eps=1e-12):
    """w: (out, in) -> w / sigma_max(w). Deterministic power iteration (mirrors
    torch.nn.utils.spectral_norm's effective weight at convergence)."""
    u = jnp.full((w.shape[0],), 1.0, jnp.float32) / jnp.sqrt(float(w.shape[0]))
    v = None
    for _ in range(n_iters):
        v = w.T @ u
        v = v / (jnp.linalg.norm(v) + eps)
        u = w @ v
        u = u / (jnp.linalg.norm(u) + eps)
    sigma = u @ (w @ v)
    return w / sigma


def make_params(key, seq_len, kernel_size):
    keys = jax.random.split(key, 8)
    C = C_FEATURES
    lin_bound = 1.0 / np.sqrt(C)                      # nn.Linear default init bound
    w_scale = jax.random.uniform(keys[0], (seq_len, C), jnp.float32, -lin_bound, lin_bound)
    b_scale = jax.random.uniform(keys[1], (seq_len,), jnp.float32, -lin_bound, lin_bound)
    w_shift = jax.random.uniform(keys[2], (seq_len, C), jnp.float32, -lin_bound, lin_bound)
    b_shift = jax.random.uniform(keys[3], (seq_len,), jnp.float32, -lin_bound, lin_bound)
    w_scale = _spectral_normalize(w_scale)
    w_shift = _spectral_normalize(w_shift)

    conv_bound = 1.0 / np.sqrt(C * kernel_size)       # nn.Conv1d default init bound
    w1 = jax.random.uniform(keys[4], (C, C, kernel_size), jnp.float32, -conv_bound, conv_bound)
    b1 = jax.random.uniform(keys[5], (C,), jnp.float32, -conv_bound, conv_bound)
    w2 = jax.random.uniform(keys[6], (C, C, kernel_size), jnp.float32, -conv_bound, conv_bound)
    b2 = jax.random.uniform(keys[7], (C,), jnp.float32, -conv_bound, conv_bound)

    gamma = jnp.ones((C,), jnp.float32)               # BatchNorm1d affine defaults
    beta = jnp.zeros((C,), jnp.float32)

    ref = dict(w_scale=w_scale, b_scale=b_scale, w_shift=w_shift, b_shift=b_shift,
               w1=w1, b1=b1, w2=w2, b2=b2, gamma=gamma, beta=beta)

    # Kernel-layout params: channel-last, fused scale/shift Linear ("+1" folded in),
    # conv weights pre-flattened for the im2col contraction.
    def conv_flat(w):                                  # (Cout, Cin, K) -> (K*Cin, Cout)
        return jnp.transpose(w, (2, 1, 0)).reshape(kernel_size * C, C)

    kern = dict(
        w_fused_t=jnp.concatenate([w_scale.T, w_shift.T], axis=1),   # (C, 2S)
        b_fused=jnp.concatenate([1.0 + b_scale, b_shift])[None, :],  # (1, 2S)
        gamma_r=gamma[None, :],                                      # (1, C)
        beta_r=beta[None, :],
        w1_flat=conv_flat(w1), b1_r=b1[None, :],
        w2_flat=conv_flat(w2), b2_r=b2[None, :],
    )
    return kern, ref


# ---------------- plain-JAX reference of the PyTorch forward ----------------
def reference_forward(x_ncl, z, ref, dilations):
    hi_prec = lax.Precision.HIGHEST

    def cbn(x):
        mean = x.mean(axis=(0, 2), keepdims=True)
        var = ((x - mean) ** 2).mean(axis=(0, 2), keepdims=True)
        normed = ((x - mean) / jnp.sqrt(var + BN_EPS)
                  * ref["gamma"][None, :, None] + ref["beta"][None, :, None])
        scale = (1.0 + jnp.dot(z, ref["w_scale"].T, precision=hi_prec)
                 + ref["b_scale"])[:, None, :]
        shift = (jnp.dot(z, ref["w_shift"].T, precision=hi_prec)
                 + ref["b_shift"])[:, None, :]
        return scale * normed + shift

    def conv(x, w, b, d):
        k = w.shape[2]
        total = d * (k - 1)
        lo = total // 2
        y = lax.conv_general_dilated(
            x, w, window_strides=(1,), padding=[(lo, total - lo)],
            rhs_dilation=(d,), dimension_numbers=("NCH", "OIH", "NCH"),
            precision=hi_prec)
        return y + b[None, :, None]

    skip = x_ncl
    h = jax.nn.relu(cbn(x_ncl))
    h = conv(h, ref["w1"], ref["b1"], dilations[0])
    h = jax.nn.relu(cbn(h))
    h = conv(h, ref["w2"], ref["b2"], dilations[1])
    return h + skip


if __name__ == "__main__":
    B, SEQ_LEN = 2, 8                      # inputs: (B, 256, seq_len); seq_len small
    KERNEL_SIZE = 3
    DILATIONS = (1, 2)

    key = jax.random.PRNGKey(0)
    kx, kz, kp = jax.random.split(key, 3)
    x = jax.random.normal(kx, (B, C_FEATURES, SEQ_LEN), jnp.float32)
    z = jax.random.normal(kz, (B, C_FEATURES), jnp.float32)
    kern_params, ref_params = make_params(kp, SEQ_LEN, KERNEL_SIZE)

    out = unaligned_block_forward(x, z, kern_params, dilations=DILATIONS)
    out = jax.block_until_ready(out)

    ref = reference_forward(x, z, ref_params, DILATIONS)
    np.testing.assert_allclose(np.asarray(out), np.asarray(ref),
                               rtol=1e-3, atol=1e-3)
    print("KERNEL_OK")
</pallas_src>

<mosaic_0001>
module attributes {stable_mosaic.version = 11 : i64} {
  func.func @_cbn_relu_conv_kernel(%arg0: i32, %arg1: memref<1x8x256xf32, #tpu.memory_space<vmem>>, %arg2: memref<2x256xf32, #tpu.memory_space<vmem>>, %arg3: memref<1x16x1xf32, #tpu.memory_space<vmem>>, %arg4: memref<768x256xf32, #tpu.memory_space<vmem>>, %arg5: memref<1x256xf32, #tpu.memory_space<vmem>>, %arg6: memref<1x8x256xf32, #tpu.memory_space<vmem>>, %arg7: memref<10x256xf32, #tpu.memory_space<vmem>>) attributes {dimension_semantics = [#tpu.dimension_semantics<parallel>], iteration_bounds = array<i64: 2>, scalar_prefetch = 0 : i64, scratch_operands = 1 : i64, tpu.core_type = #tpu.core_type<tc>, window_params = [{transform_indices = @transform_0, window_bounds = array<i64: 1, 8, 256>}, {pipeline_mode = #tpu.pipeline_mode<synchronous>, transform_indices = @transform_1, window_bounds = array<i64: 2, 256>}, {transform_indices = @transform_2, window_bounds = array<i64: 1, 16, 1>}, {pipeline_mode = #tpu.pipeline_mode<synchronous>, transform_indices = @transform_3, window_bounds = array<i64: 768, 256>}, {pipeline_mode = #tpu.pipeline_mode<synchronous>, transform_indices = @transform_4, window_bounds = array<i64: 1, 256>}, {transform_indices = @transform_5, window_bounds = array<i64: 1, 8, 256>}]} {
    %c0 = arith.constant 0 : index
    %c0_0 = arith.constant 0 : index
    %0 = vector.load %arg2[%c0, %c0_0] : memref<2x256xf32, #tpu.memory_space<vmem>>, vector<1x256xf32>
    %c1 = arith.constant 1 : index
    %c0_1 = arith.constant 0 : index
    %1 = vector.load %arg2[%c1, %c0_1] : memref<2x256xf32, #tpu.memory_space<vmem>>, vector<1x256xf32>
    %c0_2 = arith.constant 0 : index
    %c0_3 = arith.constant 0 : index
    %c0_4 = arith.constant 0 : index
    %2 = vector.load %arg3[%c0_2, %c0_3, %c0_4] : memref<1x16x1xf32, #tpu.memory_space<vmem>>, vector<1x16x1xf32>
    %3 = vector.shape_cast %2 : vector<1x16x1xf32> to vector<16x1xf32>
    %4 = vector.extract_strided_slice %3 {offsets = [0, 0], sizes = [8, 1], strides = [1, 1]} : vector<16x1xf32> to vector<8x1xf32>
    %5 = vector.extract_strided_slice %3 {offsets = [8, 0], sizes = [8, 1], strides = [1, 1]} : vector<16x1xf32> to vector<8x1xf32>
    %c0_5 = arith.constant 0 : index
    %c0_6 = arith.constant 0 : index
    %c0_7 = arith.constant 0 : index
    %6 = vector.load %arg1[%c0_5, %c0_6, %c0_7] : memref<1x8x256xf32, #tpu.memory_space<vmem>>, vector<1x8x256xf32>
    %7 = vector.shape_cast %6 : vector<1x8x256xf32> to vector<8x256xf32>
    %8 = vector.broadcast %0 : vector<1x256xf32> to vector<8x256xf32>
    %9 = arith.mulf %7, %8 : vector<8x256xf32>
    %10 = vector.broadcast %1 : vector<1x256xf32> to vector<8x256xf32>
    %11 = arith.addf %9, %10 : vector<8x256xf32>
    %12 = vector.broadcast %4 : vector<8x1xf32> to vector<8x256xf32>
    %13 = arith.mulf %12, %11 : vector<8x256xf32>
    %14 = vector.broadcast %5 : vector<8x1xf32> to vector<8x256xf32>
    %15 = arith.addf %13, %14 : vector<8x256xf32>
    %cst = arith.constant 0.000000e+00 : f32
    %16 = vector.broadcast %cst : f32 to vector<8x256xf32>
    %17 = arith.maximumf %15, %16 : vector<8x256xf32>
    %cst_8 = arith.constant 0.000000e+00 : f32
    %18 = vector.broadcast %cst_8 : f32 to vector<1x256xf32>
    %c0_9 = arith.constant 0 : index
    %c0_10 = arith.constant 0 : index
    %19 = vector.load %arg7[%c0_9, %c0_10] : memref<10x256xf32, #tpu.memory_space<vmem>>, vector<1x256xf32>
    tpu.vector_store %arg7[%c0_9, %c0_10], %18 {strides = array<i32>} : memref<10x256xf32, #tpu.memory_space<vmem>>, vector<1x256xf32>,
    %cst_11 = arith.constant 0.000000e+00 : f32
    %20 = vector.broadcast %cst_11 : f32 to vector<1x256xf32>
    %c9 = arith.constant 9 : index
    %c0_12 = arith.constant 0 : index
    %21 = vector.load %arg7[%c9, %c0_12] : memref<10x256xf32, #tpu.memory_space<vmem>>, vector<1x256xf32>
    tpu.vector_store %arg7[%c9, %c0_12], %20 {strides = array<i32>} : memref<10x256xf32, #tpu.memory_space<vmem>>, vector<1x256xf32>,
    %c1_13 = arith.constant 1 : index
    %c0_14 = arith.constant 0 : index
    %22 = vector.load %arg7[%c1_13, %c0_14] : memref<10x256xf32, #tpu.memory_space<vmem>>, vector<8x256xf32>
    tpu.vector_store %arg7[%c1_13, %c0_14], %17 {strides = array<i32>} : memref<10x256xf32, #tpu.memory_space<vmem>>, vector<8x256xf32>,
    %c0_15 = arith.constant 0 : index
    %c0_16 = arith.constant 0 : index
    %23 = vector.load %arg7[%c0_15, %c0_16] : memref<10x256xf32, #tpu.memory_space<vmem>>, vector<8x256xf32>
    %c1_17 = arith.constant 1 : index
    %c0_18 = arith.constant 0 : index
    %24 = vector.load %arg7[%c1_17, %c0_18] : memref<10x256xf32, #tpu.memory_space<vmem>>, vector<8x256xf32>
    %c2 = arith.constant 2 : index
    %c0_19 = arith.constant 0 : index
    %25 = vector.load %arg7[%c2, %c0_19] : memref<10x256xf32, #tpu.memory_space<vmem>>, vector<8x256xf32>
    %26 = tpu.concatenate %23, %24, %25 in 1 : vector<8x256xf32>, vector<8x256xf32>, vector<8x256xf32> -> vector<8x768xf32>
    %c0_20 = arith.constant 0 : index
    %c0_21 = arith.constant 0 : index
    %27 = vector.load %arg4[%c0_20, %c0_21] : memref<768x256xf32, #tpu.memory_space<vmem>>, vector<768x256xf32>
    %cst_22 = arith.constant dense<0.000000e+00> : vector<8x256xf32>
    %28 = tpu.matmul %26, %27, %cst_22 {dimension_numbers = #tpu.dot_dimension_numbers<[1], [0], [0], [1], [0, 0, 1, 1], [], []>} : vector<8x768xf32>, vector<768x256xf32>, vector<8x256xf32> -> vector<8x256xf32>
    %c0_23 = arith.constant 0 : index
    %c0_24 = arith.constant 0 : index
    %29 = vector.load %arg5[%c0_23, %c0_24] : memref<1x256xf32, #tpu.memory_space<vmem>>, vector<1x256xf32>
    %30 = vector.broadcast %29 : vector<1x256xf32> to vector<8x256xf32>
    %31 = arith.addf %28, %30 : vector<8x256xf32>
    %c0_25 = arith.constant 0 : index
    %c0_26 = arith.constant 0 : index
    %c0_27 = arith.constant 0 : index
    %32 = vector.load %arg6[%c0_25, %c0_26, %c0_27] : memref<1x8x256xf32, #tpu.memory_space<vmem>>, vector<1x8x256xf32>
    %33 = vector.shape_cast %32 : vector<1x8x256xf32> to vector<8x256xf32>
    %34 = vector.shape_cast %31 : vector<8x256xf32> to vector<1x8x256xf32>
    tpu.vector_store %arg6[%c0_25, %c0_26, %c0_27], %34 {strides = array<i32>} : memref<1x8x256xf32, #tpu.memory_space<vmem>>, vector<1x8x256xf32>,
    return
  }
  func.func @transform_0(%arg0: i32) -> (i32, i32, i32) {
    %c0_i32 = arith.constant 0 : i32
    %c0_i32_0 = arith.constant 0 : i32
    %c0_i32_1 = arith.constant 0 : i32
    return %arg0, %c0_i32, %c0_i32_0 : i32, i32, i32
  }
  func.func @transform_1(%arg0: i32) -> (i32, i32) {
    %c0_i32 = arith.constant 0 : i32
    %c0_i32_0 = arith.constant 0 : i32
    %c0_i32_1 = arith.constant 0 : i32
    return %c0_i32, %c0_i32_0 : i32, i32
  }
  func.func @transform_2(%arg0: i32) -> (i32, i32, i32) {
    %c0_i32 = arith.constant 0 : i32
    %c0_i32_0 = arith.constant 0 : i32
    %c0_i32_1 = arith.constant 0 : i32
    return %arg0, %c0_i32, %c0_i32_0 : i32, i32, i32
  }
  func.func @transform_3(%arg0: i32) -> (i32, i32) {
    %c0_i32 = arith.constant 0 : i32
    %c0_i32_0 = arith.constant 0 : i32
    %c0_i32_1 = arith.constant 0 : i32
    return %c0_i32, %c0_i32_0 : i32, i32
  }
  func.func @transform_4(%arg0: i32) -> (i32, i32) {
    %c0_i32 = arith.constant 0 : i32
    %c0_i32_0 = arith.constant 0 : i32
    %c0_i32_1 = arith.constant 0 : i32
    return %c0_i32, %c0_i32_0 : i32, i32
  }
  func.func @transform_5(%arg0: i32) -> (i32, i32, i32) {
    %c0_i32 = arith.constant 0 : i32
    %c0_i32_0 = arith.constant 0 : i32
    %c0_i32_1 = arith.constant 0 : i32
    return %arg0, %c0_i32, %c0_i32_0 : i32, i32, i32
  }
}

module attributes {stable_mosaic.version = 11 : i64} {
  func.func @_bn_stats_kernel(%arg0: i32, %arg1: memref<16x256xf32, #tpu.memory_space<vmem>>, %arg2: memref<1x256xf32, #tpu.memory_space<vmem>>, %arg3: memref<1x256xf32, #tpu.memory_space<vmem>>, %arg4: memref<2x256xf32, #tpu.memory_space<vmem>>, %arg5: memref<8x256xf32, #tpu.memory_space<vmem>>, %arg6: memref<8x256xf32, #tpu.memory_space<vmem>>) attributes {dimension_semantics = [#tpu.dimension_semantics<arbitrary>], iteration_bounds = array<i64: 1>, scalar_prefetch = 0 : i64, scratch_operands = 2 : i64, tpu.core_type = #tpu.core_type<tc>, window_params = [{transform_indices = @transform_0, window_bounds = array<i64: 16, 256>}, {pipeline_mode = #tpu.pipeline_mode<synchronous>, transform_indices = @transform_1, window_bounds = array<i64: 1, 256>}, {pipeline_mode = #tpu.pipeline_mode<synchronous>, transform_indices = @transform_2, window_bounds = array<i64: 1, 256>}, {pipeline_mode = #tpu.pipeline_mode<synchronous>, transform_indices = @transform_3, window_bounds = array<i64: 2, 256>}]} {
    %c0_i32 = arith.constant 0 : i32
    %0 = arith.cmpi eq, %arg0, %c0_i32 : i32
    %1 = arith.extui %0 : i1 to i32
    %c0_i32_0 = arith.constant 0 : i32
    %2 = arith.cmpi ne, %1, %c0_i32_0 : i32
    scf.if %2 {
      %cst_13 = arith.constant 0.000000e+00 : f32
      %17 = vector.broadcast %cst_13 : f32 to vector<8x256xf32>
      %c0_14 = arith.constant 0 : index
      %c0_15 = arith.constant 0 : index
      %18 = vector.load %arg5[%c0_14, %c0_15] : memref<8x256xf32, #tpu.memory_space<vmem>>, vector<8x256xf32>
      tpu.vector_store %arg5[%c0_14, %c0_15], %17 {strides = array<i32>} : memref<8x256xf32, #tpu.memory_space<vmem>>, vector<8x256xf32>,
      %cst_16 = arith.constant 0.000000e+00 : f32
      %19 = vector.broadcast %cst_16 : f32 to vector<8x256xf32>
      %c0_17 = arith.constant 0 : index
      %c0_18 = arith.constant 0 : index
      %20 = vector.load %arg6[%c0_17, %c0_18] : memref<8x256xf32, #tpu.memory_space<vmem>>, vector<8x256xf32>
      tpu.vector_store %arg6[%c0_17, %c0_18], %19 {strides = array<i32>} : memref<8x256xf32, #tpu.memory_space<vmem>>, vector<8x256xf32>,
    } else {
    }
    %c0 = arith.constant 0 : index
    %c0_1 = arith.constant 0 : index
    %3 = vector.load %arg1[%c0, %c0_1] : memref<16x256xf32, #tpu.memory_space<vmem>>, vector<16x256xf32>
    %4 = vector.shape_cast %3 : vector<16x256xf32> to vector<2x8x256xf32>
    %c0_2 = arith.constant 0 : index
    %c0_3 = arith.constant 0 : index
    %5 = vector.load %arg5[%c0_2, %c0_3] : memref<8x256xf32, #tpu.memory_space<vmem>>, vector<8x256xf32>
    %cst = arith.constant dense<0.000000e+00> : vector<8x256xf32>
    %6 = vector.multi_reduction <add>, %4, %cst [0] : vector<2x8x256xf32> to vector<8x256xf32>
    %7 = arith.addf %5, %6 : vector<8x256xf32>
    %c0_4 = arith.constant 0 : index
    %c0_5 = arith.constant 0 : index
    %8 = vector.load %arg5[%c0_4, %c0_5] : memref<8x256xf32, #tpu.memory_space<vmem>>, vector<8x256xf32>
    tpu.vector_store %arg5[%c0_4, %c0_5], %7 {strides = array<i32>} : memref<8x256xf32, #tpu.memory_space<vmem>>, vector<8x256xf32>,
    %c0_6 = arith.constant 0 : index
    %c0_7 = arith.constant 0 : index
    %9 = vector.load %arg6[%c0_6, %c0_7] : memref<8x256xf32, #tpu.memory_space<vmem>>, vector<8x256xf32>
    %10 = arith.mulf %4, %4 : vector<2x8x256xf32>
    %cst_8 = arith.constant dense<0.000000e+00> : vector<8x256xf32>
    %11 = vector.multi_reduction <add>, %10, %cst_8 [0] : vector<2x8x256xf32> to vector<8x256xf32>
    %12 = arith.addf %9, %11 : vector<8x256xf32>
    %c0_9 = arith.constant 0 : index
    %c0_10 = arith.constant 0 : index
    %13 = vector.load %arg6[%c0_9, %c0_10] : memref<8x256xf32, #tpu.memory_space<vmem>>, vector<8x256xf32>
    tpu.vector_store %arg6[%c0_9, %c0_10], %12 {strides = array<i32>} : memref<8x256xf32, #tpu.memory_space<vmem>>, vector<8x256xf32>,
    %c0_i32_11 = arith.constant 0 : i32
    %14 = arith.cmpi eq, %arg0, %c0_i32_11 : i32
    %15 = arith.extui %14 : i1 to i32
    %c0_i32_12 = arith.constant 0 : i32
    %16 = arith.cmpi ne, %15, %c0_i32_12 : i32
    scf.if %16 {
      %c0_13 = arith.constant 0 : index
      %c0_14 = arith.constant 0 : index
      %17 = vector.load %arg5[%c0_13, %c0_14] : memref<8x256xf32, #tpu.memory_space<vmem>>, vector<8x256xf32>
      %cst_15 = arith.constant dense<0.000000e+00> : vector<256xf32>
      %18 = vector.multi_reduction <add>, %17, %cst_15 [0] : vector<8x256xf32> to vector<256xf32>
      %19 = vector.shape_cast %18 : vector<256xf32> to vector<1x256xf32>
      %cst_16 = arith.constant 6.250000e-02 : f32
      %20 = vector.broadcast %cst_16 : f32 to vector<1x256xf32>
      %21 = arith.mulf %19, %20 : vector<1x256xf32>
      %c0_17 = arith.constant 0 : index
      %c0_18 = arith.constant 0 : index
      %22 = vector.load %arg6[%c0_17, %c0_18] : memref<8x256xf32, #tpu.memory_space<vmem>>, vector<8x256xf32>
      %cst_19 = arith.constant dense<0.000000e+00> : vector<256xf32>
      %23 = vector.multi_reduction <add>, %22, %cst_19 [0] : vector<8x256xf32> to vector<256xf32>
      %24 = vector.shape_cast %23 : vector<256xf32> to vector<1x256xf32>
      %cst_20 = arith.constant 6.250000e-02 : f32
      %25 = vector.broadcast %cst_20 : f32 to vector<1x256xf32>
      %26 = arith.mulf %24, %25 : vector<1x256xf32>
      %27 = arith.mulf %21, %21 : vector<1x256xf32>
      %28 = arith.subf %26, %27 : vector<1x256xf32>
      %cst_21 = arith.constant 0.000000e+00 : f32
      %29 = vector.broadcast %cst_21 : f32 to vector<1x256xf32>
      %30 = arith.maximumf %28, %29 : vector<1x256xf32>
      %c0_22 = arith.constant 0 : index
      %c0_23 = arith.constant 0 : index
      %31 = vector.load %arg2[%c0_22, %c0_23] : memref<1x256xf32, #tpu.memory_space<vmem>>, vector<1x256xf32>
      %cst_24 = arith.constant 9.99999974E-6 : f32
      %32 = vector.broadcast %cst_24 : f32 to vector<1x256xf32>
      %33 = arith.addf %30, %32 : vector<1x256xf32>
      %34 = math.rsqrt %33 : vector<1x256xf32>
      %35 = arith.mulf %31, %34 : vector<1x256xf32>
      %c0_25 = arith.constant 0 : index
      %c0_26 = arith.constant 0 : index
      %36 = vector.load %arg4[%c0_25, %c0_26] : memref<2x256xf32, #tpu.memory_space<vmem>>, vector<1x256xf32>
      tpu.vector_store %arg4[%c0_25, %c0_26], %35 {strides = array<i32>} : memref<2x256xf32, #tpu.memory_space<vmem>>, vector<1x256xf32>,
      %c0_27 = arith.constant 0 : index
      %c0_28 = arith.constant 0 : index
      %37 = vector.load %arg3[%c0_27, %c0_28] : memref<1x256xf32, #tpu.memory_space<vmem>>, vector<1x256xf32>
      %38 = arith.mulf %21, %35 : vector<1x256xf32>
      %39 = arith.subf %37, %38 : vector<1x256xf32>
      %c1 = arith.constant 1 : index
      %c0_29 = arith.constant 0 : index
      %40 = vector.load %arg4[%c1, %c0_29] : memref<2x256xf32, #tpu.memory_space<vmem>>, vector<1x256xf32>
      tpu.vector_store %arg4[%c1, %c0_29], %39 {strides = array<i32>} : memref<2x256xf32, #tpu.memory_space<vmem>>, vector<1x256xf32>,
    } else {
    }
    return
  }
  func.func @transform_0(%arg0: i32) -> (i32, i32) {
    %c0_i32 = arith.constant 0 : i32
    %c0_i32_0 = arith.constant 0 : i32
    return %arg0, %c0_i32 : i32, i32
  }
  func.func @transform_1(%arg0: i32) -> (i32, i32) {
    %c0_i32 = arith.constant 0 : i32
    %c0_i32_0 = arith.constant 0 : i32
    %c0_i32_1 = arith.constant 0 : i32
    return %c0_i32, %c0_i32_0 : i32, i32
  }
  func.func @transform_2(%arg0: i32) -> (i32, i32) {
    %c0_i32 = arith.constant 0 : i32
    %c0_i32_0 = arith.constant 0 : i32
    %c0_i32_1 = arith.constant 0 : i32
    return %c0_i32, %c0_i32_0 : i32, i32
  }
  func.func @transform_3(%arg0: i32) -> (i32, i32) {
    %c0_i32 = arith.constant 0 : i32
    %c0_i32_0 = arith.constant 0 : i32
    %c0_i32_1 = arith.constant 0 : i32
    return %c0_i32, %c0_i32_0 : i32, i32
  }
}

module attributes {stable_mosaic.version = 11 : i64} {
  func.func @_cbn_relu_conv_res_kernel(%arg0: i32, %arg1: memref<1x8x256xf32, #tpu.memory_space<vmem>>, %arg2: memref<2x256xf32, #tpu.memory_space<vmem>>, %arg3: memref<1x16x1xf32, #tpu.memory_space<vmem>>, %arg4: memref<768x256xf32, #tpu.memory_space<vmem>>, %arg5: memref<1x256xf32, #tpu.memory_space<vmem>>, %arg6: memref<1x8x256xf32, #tpu.memory_space<vmem>>, %arg7: memref<1x8x256xf32, #tpu.memory_space<vmem>>, %arg8: memref<12x256xf32, #tpu.memory_space<vmem>>) attributes {dimension_semantics = [#tpu.dimension_semantics<parallel>], iteration_bounds = array<i64: 2>, scalar_prefetch = 0 : i64, scratch_operands = 1 : i64, tpu.core_type = #tpu.core_type<tc>, window_params = [{transform_indices = @transform_0, window_bounds = array<i64: 1, 8, 256>}, {pipeline_mode = #tpu.pipeline_mode<synchronous>, transform_indices = @transform_1, window_bounds = array<i64: 2, 256>}, {transform_indices = @transform_2, window_bounds = array<i64: 1, 16, 1>}, {pipeline_mode = #tpu.pipeline_mode<synchronous>, transform_indices = @transform_3, window_bounds = array<i64: 768, 256>}, {pipeline_mode = #tpu.pipeline_mode<synchronous>, transform_indices = @transform_4, window_bounds = array<i64: 1, 256>}, {transform_indices = @transform_5, window_bounds = array<i64: 1, 8, 256>}, {transform_indices = @transform_6, window_bounds = array<i64: 1, 8, 256>}]} {
    %c0 = arith.constant 0 : index
    %c0_0 = arith.constant 0 : index
    %0 = vector.load %arg2[%c0, %c0_0] : memref<2x256xf32, #tpu.memory_space<vmem>>, vector<1x256xf32>
    %c1 = arith.constant 1 : index
    %c0_1 = arith.constant 0 : index
    %1 = vector.load %arg2[%c1, %c0_1] : memref<2x256xf32, #tpu.memory_space<vmem>>, vector<1x256xf32>
    %c0_2 = arith.constant 0 : index
    %c0_3 = arith.constant 0 : index
    %c0_4 = arith.constant 0 : index
    %2 = vector.load %arg3[%c0_2, %c0_3, %c0_4] : memref<1x16x1xf32, #tpu.memory_space<vmem>>, vector<1x16x1xf32>
    %3 = vector.shape_cast %2 : vector<1x16x1xf32> to vector<16x1xf32>
    %4 = vector.extract_strided_slice %3 {offsets = [0, 0], sizes = [8, 1], strides = [1, 1]} : vector<16x1xf32> to vector<8x1xf32>
    %5 = vector.extract_strided_slice %3 {offsets = [8, 0], sizes = [8, 1], strides = [1, 1]} : vector<16x1xf32> to vector<8x1xf32>
    %c0_5 = arith.constant 0 : index
    %c0_6 = arith.constant 0 : index
    %c0_7 = arith.constant 0 : index
    %6 = vector.load %arg1[%c0_5, %c0_6, %c0_7] : memref<1x8x256xf32, #tpu.memory_space<vmem>>, vector<1x8x256xf32>
    %7 = vector.shape_cast %6 : vector<1x8x256xf32> to vector<8x256xf32>
    %8 = vector.broadcast %0 : vector<1x256xf32> to vector<8x256xf32>
    %9 = arith.mulf %7, %8 : vector<8x256xf32>
    %10 = vector.broadcast %1 : vector<1x256xf32> to vector<8x256xf32>
    %11 = arith.addf %9, %10 : vector<8x256xf32>
    %12 = vector.broadcast %4 : vector<8x1xf32> to vector<8x256xf32>
    %13 = arith.mulf %12, %11 : vector<8x256xf32>
    %14 = vector.broadcast %5 : vector<8x1xf32> to vector<8x256xf32>
    %15 = arith.addf %13, %14 : vector<8x256xf32>
    %cst = arith.constant 0.000000e+00 : f32
    %16 = vector.broadcast %cst : f32 to vector<8x256xf32>
    %17 = arith.maximumf %15, %16 : vector<8x256xf32>
    %cst_8 = arith.constant 0.000000e+00 : f32
    %18 = vector.broadcast %cst_8 : f32 to vector<2x256xf32>
    %c0_9 = arith.constant 0 : index
    %c0_10 = arith.constant 0 : index
    %19 = vector.load %arg8[%c0_9, %c0_10] : memref<12x256xf32, #tpu.memory_space<vmem>>, vector<2x256xf32>
    tpu.vector_store %arg8[%c0_9, %c0_10], %18 {strides = array<i32>} : memref<12x256xf32, #tpu.memory_space<vmem>>, vector<2x256xf32>,
    %cst_11 = arith.constant 0.000000e+00 : f32
    %20 = vector.broadcast %cst_11 : f32 to vector<2x256xf32>
    %c10 = arith.constant 10 : index
    %c0_12 = arith.constant 0 : index
    %21 = vector.load %arg8[%c10, %c0_12] : memref<12x256xf32, #tpu.memory_space<vmem>>, vector<2x256xf32>
    tpu.vector_store %arg8[%c10, %c0_12], %20 {strides = array<i32>} : memref<12x256xf32, #tpu.memory_space<vmem>>, vector<2x256xf32>,
    %c2 = arith.constant 2 : index
    %c0_13 = arith.constant 0 : index
    %22 = vector.load %arg8[%c2, %c0_13] : memref<12x256xf32, #tpu.memory_space<vmem>>, vector<8x256xf32>
    tpu.vector_store %arg8[%c2, %c0_13], %17 {strides = array<i32>} : memref<12x256xf32, #tpu.memory_space<vmem>>, vector<8x256xf32>,
    %c0_14 = arith.constant 0 : index
    %c0_15 = arith.constant 0 : index
    %23 = vector.load %arg8[%c0_14, %c0_15] : memref<12x256xf32, #tpu.memory_space<vmem>>, vector<8x256xf32>
    %c2_16 = arith.constant 2 : index
    %c0_17 = arith.constant 0 : index
    %24 = vector.load %arg8[%c2_16, %c0_17] : memref<12x256xf32, #tpu.memory_space<vmem>>, vector<8x256xf32>
    %c4 = arith.constant 4 : index
    %c0_18 = arith.constant 0 : index
    %25 = vector.load %arg8[%c4, %c0_18] : memref<12x256xf32, #tpu.memory_space<vmem>>, vector<8x256xf32>
    %26 = tpu.concatenate %23, %24, %25 in 1 : vector<8x256xf32>, vector<8x256xf32>, vector<8x256xf32> -> vector<8x768xf32>
    %c0_19 = arith.constant 0 : index
    %c0_20 = arith.constant 0 : index
    %27 = vector.load %arg4[%c0_19, %c0_20] : memref<768x256xf32, #tpu.memory_space<vmem>>, vector<768x256xf32>
    %cst_21 = arith.constant dense<0.000000e+00> : vector<8x256xf32>
    %28 = tpu.matmul %26, %27, %cst_21 {dimension_numbers = #tpu.dot_dimension_numbers<[1], [0], [0], [1], [0, 0, 1, 1], [], []>} : vector<8x768xf32>, vector<768x256xf32>, vector<8x256xf32> -> vector<8x256xf32>
    %c0_22 = arith.constant 0 : index
    %c0_23 = arith.constant 0 : index
    %29 = vector.load %arg5[%c0_22, %c0_23] : memref<1x256xf32, #tpu.memory_space<vmem>>, vector<1x256xf32>
    %30 = vector.broadcast %29 : vector<1x256xf32> to vector<8x256xf32>
    %31 = arith.addf %28, %30 : vector<8x256xf32>
    %c0_24 = arith.constant 0 : index
    %c0_25 = arith.constant 0 : index
    %c0_26 = arith.constant 0 : index
    %32 = vector.load %arg6[%c0_24, %c0_25, %c0_26] : memref<1x8x256xf32, #tpu.memory_space<vmem>>, vector<1x8x256xf32>
    %33 = vector.shape_cast %32 : vector<1x8x256xf32> to vector<8x256xf32>
    %34 = arith.addf %31, %33 : vector<8x256xf32>
    %c0_27 = arith.constant 0 : index
    %c0_28 = arith.constant 0 : index
    %c0_29 = arith.constant 0 : index
    %35 = vector.load %arg7[%c0_27, %c0_28, %c0_29] : memref<1x8x256xf32, #tpu.memory_space<vmem>>, vector<1x8x256xf32>
    %36 = vector.shape_cast %35 : vector<1x8x256xf32> to vector<8x256xf32>
    %37 = vector.shape_cast %34 : vector<8x256xf32> to vector<1x8x256xf32>
    tpu.vector_store %arg7[%c0_27, %c0_28, %c0_29], %37 {strides = array<i32>} : memref<1x8x256xf32, #tpu.memory_space<vmem>>, vector<1x8x256xf32>,
    return
  }
  func.func @transform_0(%arg0: i32) -> (i32, i32, i32) {
    %c0_i32 = arith.constant 0 : i32
    %c0_i32_0 = arith.constant 0 : i32
    %c0_i32_1 = arith.constant 0 : i32
    return %arg0, %c0_i32, %c0_i32_0 : i32, i32, i32
  }
  func.func @transform_1(%arg0: i32) -> (i32, i32) {
    %c0_i32 = arith.constant 0 : i32
    %c0_i32_0 = arith.constant 0 : i32
    %c0_i32_1 = arith.constant 0 : i32
    return %c0_i32, %c0_i32_0 : i32, i32
  }
  func.func @transform_2(%arg0: i32) -> (i32, i32, i32) {
    %c0_i32 = arith.constant 0 : i32
    %c0_i32_0 = arith.constant 0 : i32
    %c0_i32_1 = arith.constant 0 : i32
    return %arg0, %c0_i32, %c0_i32_0 : i32, i32, i32
  }
  func.func @transform_3(%arg0: i32) -> (i32, i32) {
    %c0_i32 = arith.constant 0 : i32
    %c0_i32_0 = arith.constant 0 : i32
    %c0_i32_1 = arith.constant 0 : i32
    return %c0_i32, %c0_i32_0 : i32, i32
  }
  func.func @transform_4(%arg0: i32) -> (i32, i32) {
    %c0_i32 = arith.constant 0 : i32
    %c0_i32_0 = arith.constant 0 : i32
    %c0_i32_1 = arith.constant 0 : i32
    return %c0_i32, %c0_i32_0 : i32, i32
  }
  func.func @transform_5(%arg0: i32) -> (i32, i32, i32) {
    %c0_i32 = arith.constant 0 : i32
    %c0_i32_0 = arith.constant 0 : i32
    %c0_i32_1 = arith.constant 0 : i32
    return %arg0, %c0_i32, %c0_i32_0 : i32, i32, i32
  }
  func.func @transform_6(%arg0: i32) -> (i32, i32, i32) {
    %c0_i32 = arith.constant 0 : i32
    %c0_i32_0 = arith.constant 0 : i32
    %c0_i32_1 = arith.constant 0 : i32
    return %arg0, %c0_i32, %c0_i32_0 : i32, i32, i32
  }
}

</mosaic_0001>

<bundles_post_ra>
// kernel: unaligned_block_forward.4
= control target key start
LH: loop header
LB: loop body
LE: loop exit
PB: predicated region body
PF: predicated region fallthrough
CT: control target
= control target key end

     0   :  { %v117_v60 = vlaneseq  ;;  %vm113_vm6 = vcmask 1040384   ;;  %s191_s0 = inlined_call_operand.vmem [shape: f32[16,256], index: 0, kind: input, shape index: {}]   ;;  %s192_s1 = inlined_call_operand.vmem [shape: f32[1,256], index: 1, kind: input, shape index: {}]   ;;  %s193_s3 = inlined_call_operand.vmem [shape: f32[2,256], index: 3, kind: output, shape index: {}]   ;;  %s194_s2 = inlined_call_operand.vmem [shape: f32[1,256], index: 2, kind: input, shape index: {}]  }
   0x1   :  { %v22_v0 = vld [vmem:[%s191_s0] sm:$0xff]  ;;  %v23_v1 = vld [vmem:[%s191_s0 + $0x8] sm:$0xff]  ;;  %v24_v2 = vld [vmem:[%s191_s0 + $0x10] sm:$0xff] }
   0x2   :  { %v25_v3 = vld [vmem:[%s191_s0 + $0x18] sm:$0xff]  ;;  %v28_v4 = vadd.f32 %v24_v2, %v22_v0  ;;  %v36_v5 = vmul.f32 %v22_v0, %v22_v0  ;;  %v37_v6 = vmul.f32 %v23_v1, %v23_v1  ;;  %v38_v7 = vmul.f32 %v24_v2, %v24_v2  ;;  %v87_v63 = vld [vmem:[%s192_s1] sm:$0x3] }
   0x3   :  { %v29_v8 = vadd.f32 %v25_v3, %v23_v1  ;;  %v39_v9 = vmul.f32 %v25_v3, %v25_v3  ;;  %vm119_vm7 = vcmp.lt.s32.totalorder %v117_v60, 256 }
   0x4   :  { %v40_v10 = vadd.f32 %v38_v7, %v36_v5  ;;  %v51_v11 = vrot.slane %v28_v4, 4  ;;  %v122_v7 = vld [vmem:[%s194_s2] sm:$0x3] }
   0x5   :  { %v41_v12 = vadd.f32 %v39_v9, %v37_v6  ;;  %v57_v13 = vrot.slane %v29_v8, 4 }
   0x6   :  { %v52_v14 = vadd.f32 %v51_v11, %v28_v4  ;;  %v67_v15 = vrot.slane %v40_v10, 4 }
   0x7   :  { %v58_v16 = vadd.f32 %v57_v13, %v29_v8  ;;  %v73_v17 = vrot.slane %v41_v12, 4 }
   0x8   :  { %v53_v18 = vrot.slane %v52_v14, 2  ;;  %v68_v19 = vadd.f32 %v67_v15, %v40_v10 }
   0x9   :  { %v59_v20 = vrot.slane %v58_v16, 2  ;;  %v74_v21 = vadd.f32 %v73_v17, %v41_v12 }
   0xa   :  { %v54_v22 = vadd.f32 %v53_v18, %v52_v14  ;;  %v69_v23 = vrot.slane %v68_v19, 2 }
   0xb   :  { %v60_v24 = vadd.f32 %v59_v20, %v58_v16  ;;  %v75_v25 = vrot.slane %v74_v21, 2 }
   0xc   :  { %v55_v26 = vrot.slane %v54_v22, 1  ;;  %v70_v27 = vadd.f32 %v69_v23, %v68_v19 }
   0xd   :  { %v61_v28 = vrot.slane %v60_v24, 1  ;;  %v76_v29 = vadd.f32 %v75_v25, %v74_v21 }
   0xe   :  { %v56_v30 = vadd.f32 %v55_v26, %v54_v22  ;;  %v71_v31 = vrot.slane %v70_v27, 1 }
   0xf   :  { %v62_v32 = vadd.f32 %v61_v28, %v60_v24  ;;  %v77_v33 = vrot.slane %v76_v29, 1 }
  0x10   :  { %v63_v34 = vmul.f32 0.0625, %v56_v30  ;;  %v72_v35 = vadd.f32 %v71_v31, %v70_v27 }
  0x11   :  { %v64_v36 = vmul.f32 0.0625, %v62_v32  ;;  %v78_v37 = vadd.f32 %v77_v33, %v76_v29 }
  0x12   :  { %v79_v38 = vmul.f32 0.0625, %v72_v35  ;;  %v81_v39 = vmul.f32 %v63_v34, %v63_v34 }
  0x13   :  { %v80_v40 = vmul.f32 0.0625, %v78_v37  ;;  %v82_v41 = vmul.f32 %v64_v36, %v64_v36 }
  0x14   :  { %v83_v42 = vsub.f32 %v79_v38, %v81_v39 }
  0x15   :  { %v84_v43 = vsub.f32 %v80_v40, %v82_v41 }
  0x16   :  { %v85_v44 = vmax.f32 %v83_v42, 0.0 }
  0x17   :  { %v86_v45 = vmax.f32 %v84_v43, 0.0 }
  0x18   :  { %v88_v46 = vadd.f32 1e-05, %v85_v44 }
  0x19   :  { %v89_v47 = vadd.f32 1e-05, %v86_v45 }
  0x1a   :  { %143 = vrsqrt.f32 %v88_v46  ;;  %vm96_vm0 = vweird.f32 %v88_v46 }
  0x1b   :  { %145 = vrsqrt.f32 %v89_v47  ;;  %vm106_vm2 = vweird.f32 %v89_v47 }
  0x20   :  { %v144_v48 = vpop.eup %143 }
  0x21   :  { %v146_v49 = vpop.eup %145  ;;  %v91_v50 = vmul.f32 %v144_v48, %v88_v46  ;;  %vm97_vm1 = vweird.f32 %v144_v48 }
  0x22   :  { %v101_v51 = vmul.f32 %v146_v49, %v89_v47  ;;  %vm107_vm3 = vweird.f32 %v146_v49  ;;  %vm98_vm4 = vmor %vm96_vm0, %vm97_vm1 }
  0x23   :  { %v92_v52 = vmul.f32 %v144_v48, %v91_v50  ;;  %vm108_vm5 = vmor %vm106_vm2, %vm107_vm3 }
  0x24   :  { %v102_v53 = vmul.f32 %v146_v49, %v101_v51 }
  0x25   :  { %v93_v54 = vmul.f32 0.5, %v92_v52 }
  0x26   :  { %v103_v55 = vmul.f32 0.5, %v102_v53 }
  0x27   :  { %v94_v56 = vsub.f32 1.5, %v93_v54 }
  0x28   :  { %v104_v57 = vsub.f32 1.5, %v103_v55 }
  0x29   :  { %v95_v58 = vmul.f32 %v144_v48, %v94_v56 }
  0x2a   :  { %v105_v59 = vmul.f32 %v146_v49, %v104_v57 }
  0x2b   :  { %v99_v61 = vsel %vm98_vm4, %v144_v48, %v95_v58 }
  0x2c   :  { %v109_v62 = vsel %vm108_vm5, %v146_v49, %v105_v59 }
  0x2d   :  { %v112_v0 = vrot.slane %v109_v62, 7 }
  0x2f   :  { %v114_v1 = vsel %vm113_vm6, %v99_v61, %v112_v0 }
  0x30   :  { %v116_v2 = vmul.f32 %v114_v1, %v87_v63 }
  0x32   :  { %121 = vst.msk [vmem:[%s193_s3] ss:$2 sm:$0x3] %vm119_vm7, %v116_v2  ;;  %v124_v3 = vperm.slane %v116_v2, 0  ;;  %v125_v4 = vperm.slane %v116_v2, 1 }
  0x34   :  { %v128_v5 = vmul.f32 %v124_v3, %v63_v34  ;;  %v129_v6 = vmul.f32 %v125_v4, %v64_v36 }
  0x36   :  { %v132_v8 = vrot.slane %v129_v6, 7 }
  0x38   :  { %v133_v9 = vsel %vm113_vm6, %v128_v5, %v132_v8 }
  0x39   :  { %v135_v10 = vsub.f32 %v122_v7, %v133_v9 }
  0x3b   :  { %142 = vst.msk [vmem:[%s193_s3 + $0x1] ss:$2 sm:$0x3] %vm119_vm7, %v135_v10 }

// kernel: unaligned_block_forward.5
= control target key start
LH: loop header
LB: loop body
LE: loop exit
PB: predicated region body
PF: predicated region fallthrough
CT: control target
= control target key end

     0   :  { %10 = vsyncpa [#allocation4], 0  ;;  %s993_s18 = smov 0   ;;  %s1058_s0 = inlined_call_operand.vmem [shape: f32[2,8,256], index: 0, kind: input, shape index: {}]   ;;  %s1059_s1 = inlined_call_operand.vmem [shape: f32[2,256], index: 1, kind: input, shape index: {}]   ;;  %s1060_s2 = inlined_call_operand.vmem [shape: f32[2,16,1], index: 2, kind: input, shape index: {}]   ;;  %s1061_s3 = inlined_call_operand.hbm [shape: f32[768,256], index: 3, kind: input, shape index: {}]   ;;  %s1062_s4 = inlined_call_operand.vmem [shape: f32[1,256], index: 4, kind: input, shape index: {}]   ;;  %s1063_s5 = inlined_call_operand.vmem [shape: f32[2,8,256], index: 5, kind: output, shape index: {}]  }
   0x1 LB: > { %s176_s21 = sshll.u32 %s1061_s3, 4  ;;  %s873_s22 = sadd.s32 4294967295, %s956_s18   ;;  %s956_s18 = sphi %s993_s18, %s16_s18   ;;  %s177_s21 = int_to_ptr.hbm [resolvable:$true] %s176_s21 }
   0x2   : > { %p875_p0 = scmp.ge.s32.totalorder %s956_s18, 1  ;;  %p162_p1 = scmp.lt.s32.totalorder %s956_s18, 3 }
   0x3   : > { %p900_p2 = scmp.eq.s32.totalorder %s873_s22, 0  ;;  %s958_s23 = smov [#allocation3]  }
   0x4   : > { %p163_p3 = pnand %p875_p0, %p162_p1  ;;  %s178_s24 = sshll.u32 %s958_s23, 4  ;;  %s179_s24 = int_to_ptr.vmem [resolvable:$true] %s178_s24 }
   0x5   : > { %s959_s25 = smov 256   ;;  %s960_s26 = smov 16  }
   0x6   : > { %p896_p4 = pneg %p163_p3  ;;  %213 = sbr.rel (%p163_p3) target bundleno = 332 (0x14c), region = 40 }
   0x8   : > { %p897_p5 = pnand %p900_p2, %p896_p4 }
   0xa   : > { %899 = dma.hbm_to_vmem [thread:$0]  (!%p897_p5), %s177_s21, 24576, %s179_s24, [#allocation4], %s959_s25, %s959_s25, %s960_s26  }
   0xb   : > { %951 = dma.done.wait (%p900_p2), [#allocation4], 24576  }
   0xc   : > { %953 = vsyncadd (%p900_p2), [#allocation4], 4294942720  ;;  %p247_p6 = scmp.lt.s32.totalorder %s873_s22, 1  ;;  %v961_v0 = vmov 0   ;;  %v384_v2 = vld [vmem:[#allocation3 + $0xf0] sm:$0xff]  ;;  %v382_v4 = vld [vmem:[#allocation3 + $0xe0] sm:$0xff] }
   0xd   : > { %915 = vset.pattern.permute.xlu0 %v961_v0  ;;  %552 = vmatpush.msra.mxu0 %v384_v2  ;;  %v416_v3 = vld [vmem:[#allocation3 + $0x1f0] sm:$0xff]  ;;  %v414_v5 = vld [vmem:[#allocation3 + $0x1e0] sm:$0xff]  ;;  %vm332_vm1 = vcmask 1046528   ;;  %vm345_vm2 = vcmask 1045504  }
   0xe   : > { %s1065_s22 = smov (!%p247_p6, %s873_s22), 1  ;;  %572 = vmatpush.msra.mxu1 %v416_v3  ;;  %v448_v6 = vld [vmem:[#allocation3 + $0x2f0] sm:$0xff]  ;;  %v446_v10 = vld [vmem:[#allocation3 + $0x2e0] sm:$0xff] }
   0xf   : > { %s1004_s27 = sshll.u32 %s1065_s22, 4  ;;  %v480_v7 = vld [vmem:[#allocation3 + $0x3f0] sm:$0xff]  ;;  %553 = vmatpush.msra.mxu0 %v382_v4  ;;  %592 = vmatpush.msra.mxu2 %v448_v6  ;;  %v478_v11 = vld [vmem:[#allocation3 + $0x3e0] sm:$0xff] }
  0x10   : > { %s256_s30 = scalar_lea.vmem %s1060_s2, %s1004_s27  ;;  %v380_v8 = vld [vmem:[#allocation3 + $0xd0] sm:$0xff]  ;;  %573 = vmatpush.msra.mxu1 %v414_v5  ;;  %612 = vmatpush.msra.mxu3 %v480_v7  ;;  %v378_v12 = vld [vmem:[#allocation3 + $0xc0] sm:$0xff]  ;;  %v385_v7 = vld [vmem:[#allocation3 + $0xf8] sm:$0xff]  ;;  %s251_s10 = scalar_lea.vmem %s1058_s0, %s1004_s27 }
  0x11   : > { %v265_v1 = vld [vmem:[%s256_s30] sm:$0xff]  ;;  %v412_v9 = vld [vmem:[#allocation3 + $0x1d0] sm:$0xff]  ;;  %554 = vmatpush.msra.mxu0 %v380_v8  ;;  %593 = vmatpush.msra.mxu2 %v446_v10  ;;  %v266_v16 = vld [vmem:[%s256_s30 + $0x8] sm:$0xff]  ;;  %s261_s17 = scalar_lea.vmem %s1063_s5, %s1004_s27 }
  0x12   : > { %285 = vperm.xlu0 %915, %v265_v1   ;;  %v444_v13 = vld [vmem:[#allocation3 + $0x2d0] sm:$0xff]  ;;  %v410_v14 = vld [vmem:[#allocation3 + $0x1c0] sm:$0xff]  ;;  %574 = vmatpush.msra.mxu1 %v412_v9  ;;  %v417_v8 = vld [vmem:[#allocation3 + $0x1f8] sm:$0xff] }
  0x13   : > { %v476_v15 = vld [vmem:[#allocation3 + $0x3d0] sm:$0xff]  ;;  %613 = vmatpush.msra.mxu3 %v478_v11  ;;  %555 = vmatpush.msra.mxu0 %v378_v12  ;;  %v442_v19 = vld [vmem:[#allocation3 + $0x2c0] sm:$0xff]  ;;  %v383_v11 = vld [vmem:[#allocation3 + $0xe8] sm:$0xff] }
  0x14   : > { %v376_v17 = vld [vmem:[#allocation3 + $0xb0] sm:$0xff]  ;;  %594 = vmatpush.msra.mxu2 %v444_v13  ;;  %575 = vmatpush.msra.mxu1 %v410_v14  ;;  %v474_v20 = vld [vmem:[#allocation3 + $0x3c0] sm:$0xff]  ;;  %v415_v12 = vld [vmem:[#allocation3 + $0x1e8] sm:$0xff] }
  0x15   : > { %v408_v18 = vld [vmem:[#allocation3 + $0x1b0] sm:$0xff]  ;;  %614 = vmatpush.msra.mxu3 %v476_v15  ;;  %v374_v21 = vld [vmem:[#allocation3 + $0xa0] sm:$0xff]  ;;  %556 = vmatpush.msra.mxu0 %v376_v17  ;;  %v381_v15 = vld [vmem:[#allocation3 + $0xd8] sm:$0xff] }
  0x16   : > { %v406_v22 = vld [vmem:[#allocation3 + $0x1a0] sm:$0xff]  ;;  %v440_v23 = vld [vmem:[#allocation3 + $0x2b0] sm:$0xff]  ;;  %576 = vmatpush.msra.mxu1 %v408_v18  ;;  %595 = vmatpush.msra.mxu2 %v442_v19  ;;  %v379_v19 = vld [vmem:[#allocation3 + $0xc8] sm:$0xff] }
  0x17   : > { %v472_v24 = vld [vmem:[#allocation3 + $0x3b0] sm:$0xff]  ;;  %615 = vmatpush.msra.mxu3 %v474_v20  ;;  %557 = vmatpush.msra.mxu0 %v374_v21  ;;  %v438_v27 = vld [vmem:[#allocation3 + $0x2a0] sm:$0xff]  ;;  %v411_v20 = vld [vmem:[#allocation3 + $0x1c8] sm:$0xff] }
  0x18   : > { %v372_v25 = vld [vmem:[#allocation3 + $0x90] sm:$0xff]  ;;  %577 = vmatpush.msra.mxu1 %v406_v22  ;;  %596 = vmatpush.msra.mxu2 %v440_v23  ;;  %v470_v28 = vld [vmem:[#allocation3 + $0x3a0] sm:$0xff]  ;;  %v377_v23 = vld [vmem:[#allocation3 + $0xb8] sm:$0xff] }
  0x19   : > { %v404_v26 = vld [vmem:[#allocation3 + $0x190] sm:$0xff]  ;;  %v370_v29 = vld [vmem:[#allocation3 + $0x80] sm:$0xff]  ;;  %616 = vmatpush.msra.mxu3 %v472_v24  ;;  %558 = vmatpush.msra.mxu0 %v372_v25  ;;  %v409_v24 = vld [vmem:[#allocation3 + $0x1b8] sm:$0xff] }
  0x1a   : > { %292 = vperm.xlu0 %915, %v266_v16   ;;  %v402_v30 = vld [vmem:[#allocation3 + $0x180] sm:$0xff]  ;;  %v436_v31 = vld [vmem:[#allocation3 + $0x290] sm:$0xff]  ;;  %578 = vmatpush.msra.mxu1 %v404_v26  ;;  %v413_v16 = vld [vmem:[#allocation3 + $0x1d8] sm:$0xff] }
  0x1b   : > { %597 = vmatpush.msra.mxu2 %v438_v27  ;;  %v468_v32 = vld [vmem:[#allocation3 + $0x390] sm:$0xff]  ;;  %617 = vmatpush.msra.mxu3 %v470_v28  ;;  %v434_v35 = vld [vmem:[#allocation3 + $0x280] sm:$0xff]  ;;  %v375_v27 = vld [vmem:[#allocation3 + $0xa8] sm:$0xff] }
  0x1c   : > { %v368_v33 = vld [vmem:[#allocation3 + $0x70] sm:$0xff]  ;;  %559 = vmatpush.msra.mxu0 %v370_v29  ;;  %579 = vmatpush.msra.mxu1 %v402_v30  ;;  %v466_v36 = vld [vmem:[#allocation3 + $0x380] sm:$0xff]  ;;  %v407_v28 = vld [vmem:[#allocation3 + $0x1a8] sm:$0xff] }
  0x1d   : > { %v400_v34 = vld [vmem:[#allocation3 + $0x170] sm:$0xff]  ;;  %598 = vmatpush.msra.mxu2 %v436_v31  ;;  %v366_v37 = vld [vmem:[#allocation3 + $0x60] sm:$0xff]  ;;  %618 = vmatpush.msra.mxu3 %v468_v32  ;;  %v373_v31 = vld [vmem:[#allocation3 + $0x98] sm:$0xff] }
  0x1e   : > { %560 = vmatpush.msra.mxu0 %v368_v33  ;;  %v398_v38 = vld [vmem:[#allocation3 + $0x160] sm:$0xff]  ;;  %v432_v39 = vld [vmem:[#allocation3 + $0x270] sm:$0xff]  ;;  %580 = vmatpush.msra.mxu1 %v400_v34  ;;  %v405_v32 = vld [vmem:[#allocation3 + $0x198] sm:$0xff] }
  0x1f   : > { %599 = vmatpush.msra.mxu2 %v434_v35  ;;  %v464_v40 = vld [vmem:[#allocation3 + $0x370] sm:$0xff]  ;;  %619 = vmatpush.msra.mxu3 %v466_v36  ;;  %v430_v43 = vld [vmem:[#allocation3 + $0x260] sm:$0xff]  ;;  %v371_v35 = vld [vmem:[#allocation3 + $0x88] sm:$0xff] }
  0x20   : > { %v364_v41 = vld [vmem:[#allocation3 + $0x50] sm:$0xff]  ;;  %561 = vmatpush.msra.mxu0 %v366_v37  ;;  %581 = vmatpush.msra.mxu1 %v398_v38  ;;  %v462_v44 = vld [vmem:[#allocation3 + $0x360] sm:$0xff]  ;;  %v403_v36 = vld [vmem:[#allocation3 + $0x188] sm:$0xff] }
  0x21   : > { %v396_v42 = vld [vmem:[#allocation3 + $0x150] sm:$0xff]  ;;  %600 = vmatpush.msra.mxu2 %v432_v39  ;;  %v362_v45 = vld [vmem:[#allocation3 + $0x40] sm:$0xff]  ;;  %620 = vmatpush.msra.mxu3 %v464_v40  ;;  %v369_v39 = vld [vmem:[#allocation3 + $0x78] sm:$0xff] }
  0x22   : > { %562 = vmatpush.msra.mxu0 %v364_v41  ;;  %v394_v46 = vld [vmem:[#allocation3 + $0x140] sm:$0xff]  ;;  %v428_v47 = vld [vmem:[#allocation3 + $0x250] sm:$0xff]  ;;  %582 = vmatpush.msra.mxu1 %v396_v42  ;;  %v401_v40 = vld [vmem:[#allocation3 + $0x178] sm:$0xff] }
  0x23   : > { %601 = vmatpush.msra.mxu2 %v430_v43  ;;  %v460_v48 = vld [vmem:[#allocation3 + $0x350] sm:$0xff]  ;;  %621 = vmatpush.msra.mxu3 %v462_v44  ;;  %v426_v51 = vld [vmem:[#allocation3 + $0x240] sm:$0xff]  ;;  %v367_v43 = vld [vmem:[#allocation3 + $0x68] sm:$0xff] }
  0x24   : > { %v360_v49 = vld [vmem:[#allocation3 + $0x30] sm:$0xff]  ;;  %563 = vmatpush.msra.mxu0 %v362_v45  ;;  %583 = vmatpush.msra.mxu1 %v394_v46  ;;  %v458_v52 = vld [vmem:[#allocation3 + $0x340] sm:$0xff]  ;;  %v399_v44 = vld [vmem:[#allocation3 + $0x168] sm:$0xff]  ;;  %v299_v45 = vlaneseq }
  0x25   : > { %v392_v50 = vld [vmem:[#allocation3 + $0x130] sm:$0xff]  ;;  %602 = vmatpush.msra.mxu2 %v428_v47  ;;  %v358_v53 = vld [vmem:[#allocation3 + $0x20] sm:$0xff]  ;;  %622 = vmatpush.msra.mxu3 %v460_v48  ;;  %v365_v48 = vld [vmem:[#allocation3 + $0x58] sm:$0xff] }
  0x26   : > { %564 = vmatpush.msra.mxu0 %v360_v49  ;;  %v390_v54 = vld [vmem:[#allocation3 + $0x120] sm:$0xff]  ;;  %v424_v55 = vld [vmem:[#allocation3 + $0x230] sm:$0xff]  ;;  %584 = vmatpush.msra.mxu1 %v392_v50  ;;  %v397_v49 = vld [vmem:[#allocation3 + $0x158] sm:$0xff]  ;;  %vm301_vm0 = vcmp.lt.s32.totalorder %v299_v45, 256 }
  0x27   : > { %603 = vmatpush.msra.mxu2 %v426_v51  ;;  %v456_v56 = vld [vmem:[#allocation3 + $0x330] sm:$0xff]  ;;  %623 = vmatpush.msra.mxu3 %v458_v52  ;;  %v422_v59 = vld [vmem:[#allocation3 + $0x220] sm:$0xff]  ;;  %v363_v52 = vld [vmem:[#allocation3 + $0x48] sm:$0xff] }
  0x28   : > { %v356_v57 = vld [vmem:[#allocation3 + $0x10] sm:$0xff]  ;;  %565 = vmatpush.msra.mxu0 %v358_v53  ;;  %585 = vmatpush.msra.mxu1 %v390_v54  ;;  %v454_v60 = vld [vmem:[#allocation3 + $0x320] sm:$0xff]  ;;  %v962_v53 = vmov 0.0   ;;  %v395_v54 = vld [vmem:[#allocation3 + $0x148] sm:$0xff] }
  0x29   : > { %v388_v58 = vld [vmem:[#allocation3 + $0x110] sm:$0xff]  ;;  %604 = vmatpush.msra.mxu2 %v424_v55  ;;  %v354_v61 = vld [vmem:[#allocation3] sm:$0xff]  ;;  %624 = vmatpush.msra.mxu3 %v456_v56  ;;  %303 = vst.msk [vmem:[#allocation2] ss:$8 sm:$0x3] %vm301_vm0, %v962_v53 }
  0x2a   : > { %566 = vmatpush.msra.mxu0 %v356_v57  ;;  %v386_v62 = vld [vmem:[#allocation3 + $0x100] sm:$0xff]  ;;  %v420_v63 = vld [vmem:[#allocation3 + $0x210] sm:$0xff]  ;;  %586 = vmatpush.msra.mxu1 %v388_v58  ;;  %306 = vst.msk [vmem:[#allocation2 + $0x11] ss:$8 sm:$0x3] %vm301_vm0, %v962_v53  ;;  %v361_v57 = vld [vmem:[#allocation3 + $0x38] sm:$0xff] }
  0x2b   : > { %605 = vmatpush.msra.mxu2 %v422_v59  ;;  %v452_v0 = vld [vmem:[#allocation3 + $0x310] sm:$0xff]  ;;  %625 = vmatpush.msra.mxu3 %v454_v60  ;;  %v418_v3 = vld [vmem:[#allocation3 + $0x200] sm:$0xff]  ;;  %v393_v58 = vld [vmem:[#allocation3 + $0x138] sm:$0xff] }
  0x2c   : > { %v512_v1 = vld [vmem:[#allocation3 + $0x4f0] sm:$0xff]  ;;  %567 = vmatpush.msra.mxu0 %v354_v61  ;;  %587 = vmatpush.msra.mxu1 %v386_v62  ;;  %v450_v4 = vld [vmem:[#allocation3 + $0x300] sm:$0xff]  ;;  %v359_v61 = vld [vmem:[#allocation3 + $0x28] sm:$0xff] }
  0x2d   : > { %v544_v2 = vld [vmem:[#allocation3 + $0x5f0] sm:$0xff]  ;;  %606 = vmatpush.msra.mxu2 %v420_v63  ;;  %v510_v5 = vld [vmem:[#allocation3 + $0x4e0] sm:$0xff]  ;;  %626 = vmatpush.msra.mxu3 %v452_v0  ;;  %v391_v62 = vld [vmem:[#allocation3 + $0x128] sm:$0xff] }
  0x2e   : > { %632 = vmatpush.msrb.mxu0 %v512_v1  ;;  %v542_v6 = vld [vmem:[#allocation3 + $0x5e0] sm:$0xff]  ;;  %652 = vmatpush.msrb.mxu1 %v544_v2  ;;  %v508_v9 = vld [vmem:[#allocation3 + $0x4d0] sm:$0xff]  ;;  %v357_v2 = vld [vmem:[#allocation3 + $0x18] sm:$0xff] }
  0x2f   : > { %607 = vmatpush.msra.mxu2 %v418_v3  ;;  %627 = vmatpush.msra.mxu3 %v450_v4  ;;  %v540_v10 = vld [vmem:[#allocation3 + $0x5d0] sm:$0xff]  ;;  %v506_v13 = vld [vmem:[#allocation3 + $0x4c0] sm:$0xff]  ;;  %v389_v3 = vld [vmem:[#allocation3 + $0x118] sm:$0xff] }
  0x30   : > { %633 = vmatpush.msrb.mxu0 %v510_v5  ;;  %653 = vmatpush.msrb.mxu1 %v542_v6  ;;  %v538_v14 = vld [vmem:[#allocation3 + $0x5c0] sm:$0xff]  ;;  %v504_v17 = vld [vmem:[#allocation3 + $0x4b0] sm:$0xff]  ;;  %v355_v4 = vld [vmem:[#allocation3 + $0x8] sm:$0xff] }
  0x31   : > { %672 = vmatpush.msrb.mxu2 %v385_v7  ;;  %692 = vmatpush.msrb.mxu3 %v417_v8  ;;  %v536_v18 = vld [vmem:[#allocation3 + $0x5b0] sm:$0xff]  ;;  %v502_v21 = vld [vmem:[#allocation3 + $0x4a0] sm:$0xff]  ;;  %v387_v5 = vld [vmem:[#allocation3 + $0x108] sm:$0xff] }
  0x32   : > { %634 = vmatpush.msrb.mxu0 %v508_v9  ;;  %654 = vmatpush.msrb.mxu1 %v540_v10  ;;  %v534_v22 = vld [vmem:[#allocation3 + $0x5a0] sm:$0xff]  ;;  %v500_v25 = vld [vmem:[#allocation3 + $0x490] sm:$0xff]  ;;  %v268_v9 = vld [vmem:[%s251_s10 + $0x8] sm:$0xff] }
  0x33   : > { %673 = vmatpush.msrb.mxu2 %v383_v11  ;;  %693 = vmatpush.msrb.mxu3 %v415_v12  ;;  %v532_v26 = vld [vmem:[#allocation3 + $0x590] sm:$0xff]  ;;  %v498_v29 = vld [vmem:[#allocation3 + $0x480] sm:$0xff] }
  0x34   : > { %635 = vmatpush.msrb.mxu0 %v506_v13  ;;  %655 = vmatpush.msrb.mxu1 %v538_v14  ;;  %v530_v30 = vld [vmem:[#allocation3 + $0x580] sm:$0xff]  ;;  %v496_v33 = vld [vmem:[#allocation3 + $0x470] sm:$0xff] }
  0x35   : > { %674 = vmatpush.msrb.mxu2 %v381_v15  ;;  %694 = vmatpush.msrb.mxu3 %v413_v16  ;;  %v528_v34 = vld [vmem:[#allocation3 + $0x570] sm:$0xff]  ;;  %v494_v37 = vld [vmem:[#allocation3 + $0x460] sm:$0xff] }
  0x36   : > { %636 = vmatpush.msrb.mxu0 %v504_v17  ;;  %656 = vmatpush.msrb.mxu1 %v536_v18  ;;  %v526_v38 = vld [vmem:[#allocation3 + $0x560] sm:$0xff]  ;;  %v492_v41 = vld [vmem:[#allocation3 + $0x450] sm:$0xff] }
  0x37   : > { %675 = vmatpush.msrb.mxu2 %v379_v19  ;;  %695 = vmatpush.msrb.mxu3 %v411_v20  ;;  %v524_v42 = vld [vmem:[#allocation3 + $0x550] sm:$0xff]  ;;  %v490_v46 = vld [vmem:[#allocation3 + $0x440] sm:$0xff] }
  0x38   : > { %637 = vmatpush.msrb.mxu0 %v502_v21  ;;  %657 = vmatpush.msrb.mxu1 %v534_v22  ;;  %v522_v47 = vld [vmem:[#allocation3 + $0x540] sm:$0xff]  ;;  %v488_v50 = vld [vmem:[#allocation3 + $0x430] sm:$0xff] }
  0x39   : > { %676 = vmatpush.msrb.mxu2 %v377_v23  ;;  %696 = vmatpush.msrb.mxu3 %v409_v24  ;;  %v520_v51 = vld [vmem:[#allocation3 + $0x530] sm:$0xff]  ;;  %v486_v55 = vld [vmem:[#allocation3 + $0x420] sm:$0xff] }
  0x3a   : > { %638 = vmatpush.msrb.mxu0 %v500_v25  ;;  %658 = vmatpush.msrb.mxu1 %v532_v26  ;;  %v518_v56 = vld [vmem:[#allocation3 + $0x520] sm:$0xff]  ;;  %v484_v59 = vld [vmem:[#allocation3 + $0x410] sm:$0xff] }
  0x3b   : > { %677 = vmatpush.msrb.mxu2 %v375_v27  ;;  %697 = vmatpush.msrb.mxu3 %v407_v28  ;;  %v516_v60 = vld [vmem:[#allocation3 + $0x510] sm:$0xff]  ;;  %v482_v63 = vld [vmem:[#allocation3 + $0x400] sm:$0xff]  ;;  %v449_v27 = vld [vmem:[#allocation3 + $0x2f8] sm:$0xff] }
  0x3c   : > { %639 = vmatpush.msrb.mxu0 %v498_v29  ;;  %659 = vmatpush.msrb.mxu1 %v530_v30  ;;  %v514_v0 = vld [vmem:[#allocation3 + $0x500] sm:$0xff]  ;;  %v481_v28 = vld [vmem:[#allocation3 + $0x3f8] sm:$0xff]  ;;  %v447_v30 = vld [vmem:[#allocation3 + $0x2e8] sm:$0xff] }
  0x3d   : > { %678 = vmatpush.msrb.mxu2 %v373_v31  ;;  %698 = vmatpush.msrb.mxu3 %v405_v32  ;;  %v262_v1 = vld [vmem:[%s1059_s1] ss:$2 sm:$0x3]  ;;  %v886_v10 = vld [vmem:[%s1059_s1 + $0x1] ss:$2 sm:$0x3] }
  0x3e   : > { %640 = vmatpush.msrb.mxu0 %v496_v33  ;;  %660 = vmatpush.msrb.mxu1 %v528_v34  ;;  %v270_v6 = vperm.slane %v262_v1, 0  ;;  %v271_v7 = vperm.slane %v262_v1, 1  ;;  %v267_v8 = vld [vmem:[%s251_s10] sm:$0xff]  ;;  %v277_v13 = vperm.slane %v886_v10, 0  ;;  %v278_v14 = vperm.slane %v886_v10, 1  ;;  %v479_v33 = vld [vmem:[#allocation3 + $0x3e8] sm:$0xff] }
  0x3f   : > { %679 = vmatpush.msrb.mxu2 %v371_v35  ;;  %699 = vmatpush.msrb.mxu3 %v403_v36  ;;  %v507_v1 = vld [vmem:[#allocation3 + $0x4c8] sm:$0xff] }
  0x40   : > { %641 = vmatpush.msrb.mxu0 %v494_v37  ;;  %661 = vmatpush.msrb.mxu1 %v526_v38  ;;  %v274_v11 = vmul.f32 %v270_v6, %v267_v8  ;;  %v275_v12 = vmul.f32 %v271_v7, %v268_v9  ;;  %v537_v6 = vld [vmem:[#allocation3 + $0x5b8] sm:$0xff]  ;;  %v503_v9 = vld [vmem:[#allocation3 + $0x4a8] sm:$0xff] }
  0x41   : > { %680 = vmatpush.msrb.mxu2 %v369_v39  ;;  %700 = vmatpush.msrb.mxu3 %v401_v40  ;;  %v437_v7 = vld [vmem:[#allocation3 + $0x298] sm:$0xff]  ;;  %v535_v10 = vld [vmem:[#allocation3 + $0x5a8] sm:$0xff] }
  0x42   : > { %642 = vmatpush.msrb.mxu0 %v492_v41  ;;  %662 = vmatpush.msrb.mxu1 %v524_v42  ;;  %v281_v16 = vadd.f32 %v277_v13, %v274_v11  ;;  %v282_v17 = vadd.f32 %v278_v14, %v275_v12  ;;  %v445_v41 = vld [vmem:[#allocation3 + $0x2d8] sm:$0xff]  ;;  %v435_v11 = vld [vmem:[#allocation3 + $0x288] sm:$0xff] }
  0x43   : > { %681 = vmatpush.msrb.mxu2 %v367_v43  ;;  %701 = vmatpush.msrb.mxu3 %v399_v44  ;;  %v513_v44 = vld [vmem:[#allocation3 + $0x4f8] sm:$0xff]  ;;  %v467_v12 = vld [vmem:[#allocation3 + $0x388] sm:$0xff] }
  0x44   : > { %643 = vmatpush.msrb.mxu0 %v490_v46  ;;  %663 = vmatpush.msrb.mxu1 %v522_v47  ;;  %v469_v8 = vld [vmem:[#allocation3 + $0x398] sm:$0xff] }
  0x45   : > { %682 = vmatpush.msrb.mxu2 %v365_v48  ;;  %702 = vmatpush.msrb.mxu3 %v397_v49  ;;  %v545_v48 = vld [vmem:[#allocation3 + $0x5f8] sm:$0xff] }
  0x46   : > { %644 = vmatpush.msrb.mxu0 %v488_v50  ;;  %664 = vmatpush.msrb.mxu1 %v520_v51  ;;  %v477_v49 = vld [vmem:[#allocation3 + $0x3d8] sm:$0xff]  ;;  %v511_v51 = vld [vmem:[#allocation3 + $0x4e8] sm:$0xff] }
  0x47   : > { %683 = vmatpush.msrb.mxu2 %v363_v52  ;;  %703 = vmatpush.msrb.mxu3 %v395_v54  ;;  %v443_v52 = vld [vmem:[#allocation3 + $0x2c8] sm:$0xff]  ;;  %v501_v13 = vld [vmem:[#allocation3 + $0x498] sm:$0xff] }
  0x48   : > { %645 = vmatpush.msrb.mxu0 %v486_v55  ;;  %665 = vmatpush.msrb.mxu1 %v518_v56  ;;  %v543_v55 = vld [vmem:[#allocation3 + $0x5e8] sm:$0xff]  ;;  %v533_v14 = vld [vmem:[#allocation3 + $0x598] sm:$0xff] }
  0x49   : > { %684 = vmatpush.msrb.mxu2 %v361_v57  ;;  %704 = vmatpush.msrb.mxu3 %v393_v58  ;;  %v475_v56 = vld [vmem:[#allocation3 + $0x3c8] sm:$0xff] }
  0x4a   : > { %646 = vmatpush.msrb.mxu0 %v484_v59  ;;  %666 = vmatpush.msrb.mxu1 %v516_v60  ;;  %v509_v59 = vld [vmem:[#allocation3 + $0x4d8] sm:$0xff] }
  0x4b   : > { %685 = vmatpush.msrb.mxu2 %v359_v61  ;;  %705 = vmatpush.msrb.mxu3 %v391_v62  ;;  %v541_v60 = vld [vmem:[#allocation3 + $0x5d8] sm:$0xff] }
  0x4c   : > { %647 = vmatpush.msrb.mxu0 %v482_v63  ;;  %667 = vmatpush.msrb.mxu1 %v514_v0  ;;  %v441_v62 = vld [vmem:[#allocation3 + $0x2b8] sm:$0xff] }
  0x4d   : > { %686 = vmatpush.msrb.mxu2 %v357_v2  ;;  %706 = vmatpush.msrb.mxu3 %v389_v3  ;;  %v473_v63 = vld [vmem:[#allocation3 + $0x3b8] sm:$0xff]  ;;  %v539_v2 = vld [vmem:[#allocation3 + $0x5c8] sm:$0xff] }
  0x4e   : > { %v439_v3 = vld [vmem:[#allocation3 + $0x2a8] sm:$0xff] }
  0x4f   : > { %687 = vmatpush.msrb.mxu2 %v355_v4  ;;  %707 = vmatpush.msrb.mxu3 %v387_v5  ;;  %v471_v4 = vld [vmem:[#allocation3 + $0x3a8] sm:$0xff]  ;;  %v505_v5 = vld [vmem:[#allocation3 + $0x4b8] sm:$0xff] }
  0x84   : > { %v286_v15 = vpop.permute.xlu0 %285 }
  0x85   : > { %v288_v18 = vmul.f32 %v286_v15, %v281_v16  ;;  %v289_v19 = vmul.f32 %v286_v15, %v282_v17  ;;  %v433_v15 = vld [vmem:[#allocation3 + $0x278] sm:$0xff]  ;;  %v499_v17 = vld [vmem:[#allocation3 + $0x488] sm:$0xff] }
  0x86   : > { %v465_v16 = vld [vmem:[#allocation3 + $0x378] sm:$0xff] }
  0x8c   : > { %v293_v20 = vpop.permute.xlu0 %292 }
  0x8d   : > { %v295_v21 = vadd.f32 %v293_v20, %v288_v18  ;;  %v296_v22 = vadd.f32 %v293_v20, %v289_v19  ;;  %v531_v18 = vld [vmem:[#allocation3 + $0x588] sm:$0xff] }
  0x8e   : > { %v431_v19 = vld [vmem:[#allocation3 + $0x268] sm:$0xff] }
  0x8f   : > { %v297_v23 = vmax.f32 %v295_v21, 0.0  ;;  %v298_v24 = vmax.f32 %v296_v22, 0.0  ;;  %v463_v20 = vld [vmem:[#allocation3 + $0x368] sm:$0xff]  ;;  %v497_v21 = vld [vmem:[#allocation3 + $0x478] sm:$0xff] }
  0x90   : > { %v529_v22 = vld [vmem:[#allocation3 + $0x578] sm:$0xff] }
  0x91   : > { %v310_v25 = vrot.slane %v297_v23, 7  ;;  %v311_v26 = vrot.slane %v298_v24, 7  ;;  %v429_v23 = vld [vmem:[#allocation3 + $0x258] sm:$0xff] }
  0x92   : > { %v461_v24 = vld [vmem:[#allocation3 + $0x358] sm:$0xff] }
  0x93   : > { %314 = vst [vmem:[#allocation2] sm:$0xfe] %v310_v25 }
  0x94   : > { %315 = vst [vmem:[#allocation2 + $0x8] sm:$0xfe] %v311_v26 }
  0x95   : > { %316 = vst [vmem:[#allocation2 + $0x10] sm:$0x1] %v310_v25  ;;  %v495_v25 = vld [vmem:[#allocation3 + $0x468] sm:$0xff] }
  0x96   : > { %317 = vst [vmem:[#allocation2 + $0x18] sm:$0x1] %v311_v26  ;;  %v527_v26 = vld [vmem:[#allocation3 + $0x568] sm:$0xff] }
  0x9a   : > { %v1020_v29 = vld [vmem:[#allocation2] sm:$0xff] }
  0x9b   : > { %v320_v31 = vld [vmem:[#allocation2] sm:$0xfe]  ;;  %568 = vmatmul.f32.vlgmr.msra.gmra.mxu0 %v1020_v29  ;;  %v1023_v32 = vld [vmem:[#allocation2 + $0x8] sm:$0xff] }
  0x9c   : > { %v333_v34 = vrot.slane %v320_v31, 1  ;;  %v321_v35 = vld [vmem:[#allocation2 + $0x8] sm:$0xfe]  ;;  %588 = vmatmul.f32.vlgmr.msra.gmra.mxu1 %v1023_v32  ;;  %712 = vmatpush.msra.mxu0 %v449_v27  ;;  %v322_v36 = vld [vmem:[#allocation2 + $0x10] sm:$0x1]  ;;  %v425_v31 = vld [vmem:[#allocation3 + $0x238] sm:$0xff] }
  0x9d   : > { %v336_v37 = vrot.slane %v321_v35, 1  ;;  %v324_v38 = vld [vmem:[#allocation2] sm:$0xfc]  ;;  %732 = vmatpush.msra.mxu1 %v481_v28  ;;  %v334_v39 = vrot.slane %v322_v36, 1  ;;  %v323_v40 = vld [vmem:[#allocation2 + $0x18] sm:$0x1] }
  0x9e   : > { %v326_v42 = vld [vmem:[#allocation2 + $0x10] sm:$0x3]  ;;  %713 = vmatpush.msra.mxu0 %v447_v30  ;;  %v337_v43 = vrot.slane %v323_v40, 1  ;;  %v325_v45 = vld [vmem:[#allocation2 + $0x8] sm:$0xfc]  ;;  %v346_v53 = vrot.slane %v324_v38, 2 }
  0x9f   : > { %v327_v46 = vld [vmem:[#allocation2 + $0x18] sm:$0x3]  ;;  %733 = vmatpush.msra.mxu1 %v479_v33  ;;  %v1027_v47 = vsel %vm332_vm1, %v333_v34, %v334_v39  ;;  %v347_v54 = vrot.slane %v326_v42, 2  ;;  %v349_v57 = vrot.slane %v325_v45, 2  ;;  %v427_v27 = vld [vmem:[#allocation3 + $0x248] sm:$0xff] }
  0xa0   : > { %608 = vmatmul.f32.vlgmr.msra.gmra.mxu2 %v1027_v47  ;;  %v1031_v50 = vsel %vm332_vm1, %v336_v37, %v337_v43  ;;  %714 = vmatpush.msra.mxu0 %v445_v41  ;;  %v350_v58 = vrot.slane %v327_v46, 2  ;;  %v459_v28 = vld [vmem:[#allocation3 + $0x348] sm:$0xff]  ;;  %v525_v30 = vld [vmem:[#allocation3 + $0x558] sm:$0xff] }
  0xa1   : > { %628 = vmatmul.f32.vlgmr.msra.gmra.mxu3 %v1031_v50  ;;  %752 = vmatpush.msra.mxu2 %v513_v44  ;;  %v1035_v61 = vsel %vm345_vm2, %v346_v53, %v347_v54  ;;  %v491_v33 = vld [vmem:[#allocation3 + $0x448] sm:$0xff]  ;;  %v489_v37 = vld [vmem:[#allocation3 + $0x438] sm:$0xff] }
  0xa2   : > { %772 = vmatpush.msra.mxu3 %v545_v48  ;;  %734 = vmatpush.msra.mxu1 %v477_v49  ;;  %v1039_v0 = vsel %vm345_vm2, %v349_v57, %v350_v58  ;;  %v523_v34 = vld [vmem:[#allocation3 + $0x548] sm:$0xff]  ;;  %v521_v38 = vld [vmem:[#allocation3 + $0x538] sm:$0xff] }
  0xa3   : > { %753 = vmatpush.msra.mxu2 %v511_v51  ;;  %715 = vmatpush.msra.mxu0 %v443_v52  ;;  %v423_v35 = vld [vmem:[#allocation3 + $0x228] sm:$0xff]  ;;  %v421_v39 = vld [vmem:[#allocation3 + $0x218] sm:$0xff]  ;;  %v546_v51 = vld [vmem:[%s1062_s4] sm:$0x3] }
  0xa4   : > { %773 = vmatpush.msra.mxu3 %v543_v55  ;;  %735 = vmatpush.msra.mxu1 %v475_v56  ;;  %v455_v36 = vld [vmem:[#allocation3 + $0x328] sm:$0xff]  ;;  %v453_v40 = vld [vmem:[#allocation3 + $0x318] sm:$0xff]  ;;  %v548_v52 = vperm.slane %v546_v51, 0 }
  0xa5   : > { %754 = vmatpush.msra.mxu2 %v509_v59  ;;  %648 = vmatmul.f32.vlgmr.msrb.gmra.mxu0 %v1035_v61  ;;  %v487_v41 = vld [vmem:[#allocation3 + $0x428] sm:$0xff]  ;;  %v485_v45 = vld [vmem:[#allocation3 + $0x418] sm:$0xff] }
  0xa6   : > { %774 = vmatpush.msra.mxu3 %v541_v60  ;;  %668 = vmatmul.f32.vlgmr.msrb.gmra.mxu1 %v1039_v0  ;;  %v519_v42 = vld [vmem:[#allocation3 + $0x528] sm:$0xff]  ;;  %v517_v46 = vld [vmem:[#allocation3 + $0x518] sm:$0xff] }
  0xa7   : > { %716 = vmatpush.msra.mxu0 %v441_v62  ;;  %736 = vmatpush.msra.mxu1 %v473_v63  ;;  %v419_v43 = vld [vmem:[#allocation3 + $0x208] sm:$0xff]  ;;  %v549_v63 = vperm.slane %v546_v51, 1 }
  0xa8   : > { %755 = vmatpush.msra.mxu2 %v507_v1  ;;  %775 = vmatpush.msra.mxu3 %v539_v2  ;;  %v451_v44 = vld [vmem:[#allocation3 + $0x308] sm:$0xff] }
  0xa9   : > { %717 = vmatpush.msra.mxu0 %v439_v3  ;;  %737 = vmatpush.msra.mxu1 %v471_v4  ;;  %v483_v48 = vld [vmem:[#allocation3 + $0x408] sm:$0xff] }
  0xaa   : > { %688 = vmatmul.f32.vlgmr.msrb.gmra.mxu2 %v1020_v29  ;;  %708 = vmatmul.f32.vlgmr.msrb.gmra.mxu3 %v1023_v32  ;;  %v493_v29 = vld [vmem:[#allocation3 + $0x458] sm:$0xff]  ;;  %v515_v49 = vld [vmem:[#allocation3 + $0x508] sm:$0xff] }
  0xab   : > { %756 = vmatpush.msra.mxu2 %v505_v5  ;;  %776 = vmatpush.msra.mxu3 %v537_v6  ;;  %v457_v32 = vld [vmem:[#allocation3 + $0x338] sm:$0xff] }
  0xac   : > { %718 = vmatpush.msra.mxu0 %v437_v7  ;;  %738 = vmatpush.msra.mxu1 %v469_v8 }
  0xad   : > { %757 = vmatpush.msra.mxu2 %v503_v9  ;;  %777 = vmatpush.msra.mxu3 %v535_v10 }
  0xae   : > { %719 = vmatpush.msra.mxu0 %v435_v11  ;;  %739 = vmatpush.msra.mxu1 %v467_v12 }
  0xaf   : > { %758 = vmatpush.msra.mxu2 %v501_v13  ;;  %778 = vmatpush.msra.mxu3 %v533_v14 }
  0xb0   : > { %720 = vmatpush.msra.mxu0 %v433_v15  ;;  %740 = vmatpush.msra.mxu1 %v465_v16 }
  0xb1   : > { %759 = vmatpush.msra.mxu2 %v499_v17  ;;  %779 = vmatpush.msra.mxu3 %v531_v18 }
  0xb2   : > { %721 = vmatpush.msra.mxu0 %v431_v19  ;;  %741 = vmatpush.msra.mxu1 %v463_v20 }
  0xb3   : > { %760 = vmatpush.msra.mxu2 %v497_v21  ;;  %780 = vmatpush.msra.mxu3 %v529_v22 }
  0xb4   : > { %722 = vmatpush.msra.mxu0 %v429_v23  ;;  %742 = vmatpush.msra.mxu1 %v461_v24 }
  0xb5   : > { %761 = vmatpush.msra.mxu2 %v495_v25  ;;  %781 = vmatpush.msra.mxu3 %v527_v26 }
  0xb6   : > { %723 = vmatpush.msra.mxu0 %v427_v27  ;;  %743 = vmatpush.msra.mxu1 %v459_v28 }
  0xb7   : > { %762 = vmatpush.msra.mxu2 %v493_v29  ;;  %782 = vmatpush.msra.mxu3 %v525_v30 }
  0xb8   : > { %724 = vmatpush.msra.mxu0 %v425_v31  ;;  %744 = vmatpush.msra.mxu1 %v457_v32 }
  0xb9   : > { %763 = vmatpush.msra.mxu2 %v491_v33  ;;  %783 = vmatpush.msra.mxu3 %v523_v34 }
  0xba   : > { %725 = vmatpush.msra.mxu0 %v423_v35  ;;  %745 = vmatpush.msra.mxu1 %v455_v36 }
  0xbb   : > { %764 = vmatpush.msra.mxu2 %v489_v37  ;;  %784 = vmatpush.msra.mxu3 %v521_v38 }
  0xbc   : > { %726 = vmatpush.msra.mxu0 %v421_v39  ;;  %746 = vmatpush.msra.mxu1 %v453_v40 }
  0xbd   : > { %765 = vmatpush.msra.mxu2 %v487_v41  ;;  %785 = vmatpush.msra.mxu3 %v519_v42 }
  0xbe   : > { %727 = vmatpush.msra.mxu0 %v419_v43  ;;  %747 = vmatpush.msra.mxu1 %v451_v44 }
  0xbf   : > { %728 = vmatmul.f32.vlgmr.msra.gmra.mxu0 %v1027_v47  ;;  %748 = vmatmul.f32.vlgmr.msra.gmra.mxu1 %v1031_v50 }
  0xc0   : > { %766 = vmatpush.msra.mxu2 %v485_v45  ;;  %786 = vmatpush.msra.mxu3 %v517_v46 }
  0xc2   : > { %767 = vmatpush.msra.mxu2 %v483_v48  ;;  %787 = vmatpush.msra.mxu3 %v515_v49 }
  0xc3   : > { %768 = vmatmul.f32.vlgmr.msra.gmra.mxu2 %v1035_v61  ;;  %788 = vmatmul.f32.vlgmr.msra.gmra.mxu3 %v1039_v0 }
 0x118   : > { %v569_v53 = vpop.f32.mrf.mxu0 }
 0x119   : > { %v570_v47 = vadd.f32 %v569_v53, %v548_v52  ;;  %v589_v54 = vpop.f32.mrf.mxu1 }
 0x11b   : > { %v590_v50 = vadd.f32 %v589_v54, %v570_v47 }
 0x122   : > { %v649_v59 = vpop.f32.mrf.mxu0 }
 0x123   : > { %v609_v55 = vpop.f32.mrf.mxu2  ;;  %v669_v61 = vpop.f32.mrf.mxu1 }
 0x124   : > { %v610_v56 = vadd.f32 %v609_v55, %v590_v50  ;;  %v629_v57 = vpop.f32.mrf.mxu3 }
 0x126   : > { %v630_v58 = vadd.f32 %v629_v57, %v610_v56 }
 0x128   : > { %v650_v60 = vadd.f32 %v649_v59, %v630_v58 }
 0x12a   : > { %v670_v62 = vadd.f32 %v669_v61, %v650_v60 }
 0x12c   : > { %792 = vst [vmem:[%s261_s17] sm:$0xff] %v670_v62 }
 0x12d   : > { %v689_v0 = vpop.f32.mrf.mxu2  ;;  %v709_v2 = vpop.f32.mrf.mxu3 }
 0x12e   : > { %v690_v1 = vadd.f32 %v689_v0, %v549_v63 }
 0x130   : > { %v710_v4 = vadd.f32 %v709_v2, %v690_v1 }
 0x13c   : > { %v729_v3 = vpop.f32.mrf.mxu0  ;;  %v749_v6 = vpop.f32.mrf.mxu1 }
 0x13d   : > { %v730_v5 = vadd.f32 %v729_v3, %v710_v4 }
 0x13f   : > { %v750_v7 = vadd.f32 %v749_v6, %v730_v5 }
 0x146   : > { %v769_v8 = vpop.f32.mrf.mxu2  ;;  %v789_v10 = vpop.f32.mrf.mxu3 }
 0x147   : > { %v770_v9 = vadd.f32 %v769_v8, %v750_v7 }
 0x149   : > { %v790_v11 = vadd.f32 %v789_v10, %v770_v9 }
 0x14b   : > { %793 = vst [vmem:[%s261_s17 + $0x8] sm:$0xff] %v790_v11 }
 0x14c PF: > { %s16_s18 = sadd.s32 1, %s956_s18  }
 0x14d   : > { %p13_p7 = scmp.ge.s32.totalorder %s16_s18, 4  }
 0x14f   :  { %15 = sbr.rel (!%p13_p7) target bundleno = 1 (0x1), region = 80 }
 0x154   :  { %815 = vsyncpa [#allocation4], 1 }
 0x155   :  { %817 = vsyncpa [#allocation4 + $0x1], 1 }

// kernel: unaligned_block_forward.7
= control target key start
LH: loop header
LB: loop body
LE: loop exit
PB: predicated region body
PF: predicated region fallthrough
CT: control target
= control target key end

     0   :  { %11 = vsyncpa [#allocation4], 0  ;;  %s1313_s0 = inlined_call_operand.vmem [shape: f32[2,8,256], index: 0, kind: input, shape index: {}]   ;;  %s1314_s1 = inlined_call_operand.vmem [shape: f32[2,256], index: 1, kind: input, shape index: {}]   ;;  %s1315_s2 = inlined_call_operand.vmem [shape: f32[2,16,1], index: 2, kind: input, shape index: {}]   ;;  %s1316_s3 = inlined_call_operand.hbm [shape: f32[768,256], index: 3, kind: input, shape index: {}]   ;;  %s1317_s4 = inlined_call_operand.vmem [shape: f32[1,256], index: 4, kind: input, shape index: {}]   ;;  %s1318_s5 = inlined_call_operand.vmem [shape: f32[2,8,256], index: 5, kind: input, shape index: {}]   ;;  %s1319_s6 = inlined_call_operand.hbm [shape: f32[2,8,256], index: 6, kind: output, shape index: {}]  }
   0x1   :  { %12 = vsyncpa [#allocation5], 0 }
   0x2   :  { %14 = vsyncpa [#allocation5 + $0x1], 0  ;;  %s1166_s21 = smov 0   ;;  %s1168_s22 = smov 0  }
   0x3   :  { %s1170_s23 = smov 0   ;;  %s1172_s24 = smov 0  }
   0x4 LB: > { %s1187_s25 = sadd.s32 4294967295, %s1124_s24   ;;  %s950_s26 = sadd.s32 4294967294, %s1124_s24   ;;  %s1124_s24 = sphi %s1172_s24, %s1325_s24   ;;  %s1120_s23 = sphi %s1170_s23, %s1324_s23   ;;  %s1116_s22 = sphi %s1168_s22, %s1323_s22   ;;  %s1112_s21 = sphi %s1166_s21, %s1322_s21  }
   0x5   : > { %s1191_s27 = sadd.s32 1, %s1124_s24   ;;  %s168_s28 = sadd.s32 1, %s1120_s23 }
   0x6   : > { %s165_s29 = ssub.s32 %s1124_s24, %s1191_s27  ;;  %p178_p0 = scmp.ne.s32.totalorder %s1120_s23, %s1116_s22 }
   0x7   : > { %p166_p1 = scmp.eq.s32.totalorder %s165_s29, 0  ;;  %p179_p2 = scmp.eq.s32.totalorder %s1187_s25, 1 }
   0x8   : > { %p184_p3 = scmp.ne.s32.totalorder %s1116_s22, %s1112_s21  ;;  %p185_p4 = scmp.eq.s32.totalorder %s950_s26, 1 }
   0x9   : > { %s1202_s30 = scalar_select %p166_p1, %s1120_s23, %s168_s28  }
   0xa   : > { %p1204_p5 = por %p179_p2, %p178_p0  ;;  %p1208_p6 = por %p185_p4, %p184_p3 }
   0xb   : > { %p951_p7 = scmp.ge.s32.totalorder %s1124_s24, 1  ;;  %p192_p8 = scmp.lt.s32.totalorder %s1124_s24, 3 }
   0xc   : > { %p987_p9 = scmp.eq.s32.totalorder %s1187_s25, 0  ;;  %s206_s11 = sshll.u32 %s1316_s3, 4  ;;  %s207_s11 = int_to_ptr.hbm [resolvable:$true] %s206_s11 }
   0xd   : > { %p193_p10 = pnand %p951_p7, %p192_p8  ;;  %s1126_s12 = smov [#allocation3]  }
   0xe   : > { %s208_s13 = sshll.u32 %s1126_s12, 4  ;;  %s1127_s14 = smov 256   ;;  %s209_s13 = int_to_ptr.vmem [resolvable:$true] %s208_s13 }
   0xf   : > { %p979_p11 = pneg %p193_p10  ;;  %s1128_s15 = smov 16  }
  0x10   : > { %251 = sbr.rel (%p193_p10) target bundleno = 347 (0x15b), region = 44 }
  0x11   : > { %p980_p12 = pnand %p987_p9, %p979_p11 }
  0x13   : > { %982 = dma.hbm_to_vmem [thread:$0]  (!%p980_p12), %s207_s11, 24576, %s209_s13, [#allocation4], %s1127_s14, %s1127_s14, %s1128_s15  }
  0x15   : > { %1103 = dma.done.wait (%p987_p9), [#allocation4], 24576  }
  0x16   : > { %1105 = vsyncadd (%p987_p9), [#allocation4], 4294942720  ;;  %p292_p13 = scmp.lt.s32.totalorder %s1187_s25, 1  ;;  %v1129_v0 = vmov 0   ;;  %v424_v2 = vld [vmem:[#allocation3 + $0xf0] sm:$0xff]  ;;  %v422_v4 = vld [vmem:[#allocation3 + $0xe0] sm:$0xff] }
  0x17   : > { %1027 = vset.pattern.permute.xlu0 %v1129_v0  ;;  %592 = vmatpush.msra.mxu0 %v424_v2  ;;  %v456_v3 = vld [vmem:[#allocation3 + $0x1f0] sm:$0xff]  ;;  %v454_v5 = vld [vmem:[#allocation3 + $0x1e0] sm:$0xff]  ;;  %vm372_vm0 = vcmask 1045504   ;;  %vm385_vm1 = vcmask 1043456   ;;  %s289_s15 = sand.u32 1, %s1116_s22   ;;  %s1078_s18 = scalar_lea.hbm %s1319_s6, 32 }
  0x18   : > { %s293_s16 = scalar_select %p292_p13, %s1187_s25, 1  ;;  %612 = vmatpush.msra.mxu1 %v456_v3  ;;  %v488_v6 = vld [vmem:[#allocation3 + $0x2f0] sm:$0xff]  ;;  %v486_v10 = vld [vmem:[#allocation3 + $0x2e0] sm:$0xff] }
  0x19   : > { %v520_v7 = vld [vmem:[#allocation3 + $0x3f0] sm:$0xff]  ;;  %593 = vmatpush.msra.mxu0 %v422_v4  ;;  %632 = vmatpush.msra.mxu2 %v488_v6  ;;  %v518_v11 = vld [vmem:[#allocation3 + $0x3e0] sm:$0xff] }
  0x1a   : > { %s1226_s17 = sshll.u32 %s293_s16, 4  ;;  %v420_v8 = vld [vmem:[#allocation3 + $0xd0] sm:$0xff]  ;;  %613 = vmatpush.msra.mxu1 %v454_v5  ;;  %652 = vmatpush.msra.mxu3 %v520_v7  ;;  %v418_v12 = vld [vmem:[#allocation3 + $0xc0] sm:$0xff]  ;;  %v425_v7 = vld [vmem:[#allocation3 + $0xf8] sm:$0xff] }
  0x1b   : > { %s301_s20 = scalar_lea.vmem %s1315_s2, %s1226_s17  ;;  %v452_v9 = vld [vmem:[#allocation3 + $0x1d0] sm:$0xff]  ;;  %594 = vmatpush.msra.mxu0 %v420_v8  ;;  %633 = vmatpush.msra.mxu2 %v486_v10  ;;  %v450_v14 = vld [vmem:[#allocation3 + $0x1c0] sm:$0xff]  ;;  %v457_v8 = vld [vmem:[#allocation3 + $0x1f8] sm:$0xff]  ;;  %s296_s10 = scalar_lea.vmem %s1313_s0, %s1226_s17 }
  0x1c   : > { %v310_v1 = vld [vmem:[%s301_s20] sm:$0xff]  ;;  %v484_v13 = vld [vmem:[#allocation3 + $0x2d0] sm:$0xff]  ;;  %v311_v16 = vld [vmem:[%s301_s20 + $0x8] sm:$0xff]  ;;  %614 = vmatpush.msra.mxu1 %v452_v9  ;;  %653 = vmatpush.msra.mxu3 %v518_v11  ;;  %s306_s19 = scalar_lea.vmem %s1318_s5, %s1226_s17  ;;  %s956_s20 = sshll.u32 %s289_s15, 4 }
  0x1d   : > { %330 = vperm.xlu0 %1027, %v310_v1   ;;  %v516_v15 = vld [vmem:[#allocation3 + $0x3d0] sm:$0xff]  ;;  %595 = vmatpush.msra.mxu0 %v418_v12  ;;  %v482_v19 = vld [vmem:[#allocation3 + $0x2c0] sm:$0xff]  ;;  %v423_v11 = vld [vmem:[#allocation3 + $0xe8] sm:$0xff]  ;;  %s291_s26 = scalar_lea.vmem [#allocation6], %s956_s20  ;;  %s972_s17 = sshll.u32 %s1187_s25, 4 }
  0x1e   : > { %v416_v17 = vld [vmem:[#allocation3 + $0xb0] sm:$0xff]  ;;  %634 = vmatpush.msra.mxu2 %v484_v13  ;;  %615 = vmatpush.msra.mxu1 %v450_v14  ;;  %v514_v20 = vld [vmem:[#allocation3 + $0x3c0] sm:$0xff]  ;;  %v455_v12 = vld [vmem:[#allocation3 + $0x1e8] sm:$0xff]  ;;  %s850_s9 = scalar_lea.hbm %s1319_s6, %s972_s17  ;;  %s839_s25 = scalar_lea.sflag [#allocation5], %s289_s15 }
  0x1f   : > { %v448_v18 = vld [vmem:[#allocation3 + $0x1b0] sm:$0xff]  ;;  %654 = vmatpush.msra.mxu3 %v516_v15  ;;  %v414_v21 = vld [vmem:[#allocation3 + $0xa0] sm:$0xff]  ;;  %596 = vmatpush.msra.mxu0 %v416_v17  ;;  %v421_v15 = vld [vmem:[#allocation3 + $0xd8] sm:$0xff]  ;;  %s854_s11 = sshll.u32 %s850_s9, 4  ;;  %s855_s11 = int_to_ptr.hbm [resolvable:$true] %s854_s11 }
  0x20   : > { %v446_v22 = vld [vmem:[#allocation3 + $0x1a0] sm:$0xff]  ;;  %v480_v23 = vld [vmem:[#allocation3 + $0x2b0] sm:$0xff]  ;;  %616 = vmatpush.msra.mxu1 %v448_v18  ;;  %635 = vmatpush.msra.mxu2 %v482_v19  ;;  %v419_v19 = vld [vmem:[#allocation3 + $0xc8] sm:$0xff]  ;;  %s1072_s12 = sshra.s32 %s855_s11, 4  ;;  %s1073_s12 = int_to_ptr.hbm [resolvable:$true] %s1072_s12 }
  0x21   : > { %v512_v24 = vld [vmem:[#allocation3 + $0x3b0] sm:$0xff]  ;;  %655 = vmatpush.msra.mxu3 %v514_v20  ;;  %597 = vmatpush.msra.mxu0 %v414_v21  ;;  %v478_v27 = vld [vmem:[#allocation3 + $0x2a0] sm:$0xff]  ;;  %v451_v20 = vld [vmem:[#allocation3 + $0x1c8] sm:$0xff]  ;;  %s1074_s13 = scalar_lea.hbm %s1073_s12, 16  ;;  %p1079_p3 = scmp.lt.s32.totalorder %s1073_s12, %s1319_s6 }
  0x22   : > { %v412_v25 = vld [vmem:[#allocation3 + $0x90] sm:$0xff]  ;;  %617 = vmatpush.msra.mxu1 %v446_v22  ;;  %636 = vmatpush.msra.mxu2 %v480_v23  ;;  %v510_v28 = vld [vmem:[#allocation3 + $0x3a0] sm:$0xff]  ;;  %v417_v23 = vld [vmem:[#allocation3 + $0xb8] sm:$0xff]  ;;  %p1075_p0 = scmp.ne.s32.totalorder %s1073_s12, %s1074_s13  ;;  %p1080_p4 = scmp.lt.s32.totalorder %s1078_s18, %s1074_s13 }
  0x23   : > { %v444_v26 = vld [vmem:[#allocation3 + $0x190] sm:$0xff]  ;;  %v410_v29 = vld [vmem:[#allocation3 + $0x80] sm:$0xff]  ;;  %656 = vmatpush.msra.mxu3 %v512_v24  ;;  %598 = vmatpush.msra.mxu0 %v412_v25  ;;  %v449_v24 = vld [vmem:[#allocation3 + $0x1b8] sm:$0xff] }
  0x24   : > { %v442_v30 = vld [vmem:[#allocation3 + $0x180] sm:$0xff]  ;;  %v476_v31 = vld [vmem:[#allocation3 + $0x290] sm:$0xff]  ;;  %618 = vmatpush.msra.mxu1 %v444_v26  ;;  %637 = vmatpush.msra.mxu2 %v478_v27  ;;  %v415_v27 = vld [vmem:[#allocation3 + $0xa8] sm:$0xff]  ;;  %p1076_p1 = pnand %p1075_p0, %p1204_p5  ;;  %p1081_p7 = por %p1080_p4, %p1079_p3 }
  0x25   : > { %337 = vperm.xlu0 %1027, %v311_v16   ;;  %v508_v32 = vld [vmem:[#allocation3 + $0x390] sm:$0xff]  ;;  %657 = vmatpush.msra.mxu3 %v510_v28  ;;  %v474_v35 = vld [vmem:[#allocation3 + $0x280] sm:$0xff]  ;;  %v453_v16 = vld [vmem:[#allocation3 + $0x1d8] sm:$0xff] }
  0x26   : > { %v408_v33 = vld [vmem:[#allocation3 + $0x70] sm:$0xff]  ;;  %599 = vmatpush.msra.mxu0 %v410_v29  ;;  %619 = vmatpush.msra.mxu1 %v442_v30  ;;  %v506_v36 = vld [vmem:[#allocation3 + $0x380] sm:$0xff]  ;;  %v447_v28 = vld [vmem:[#allocation3 + $0x1a8] sm:$0xff]  ;;  %p1077_p2 = pneg %p1076_p1 }
  0x27   : > { %v440_v34 = vld [vmem:[#allocation3 + $0x170] sm:$0xff]  ;;  %638 = vmatpush.msra.mxu2 %v476_v31  ;;  %v406_v37 = vld [vmem:[#allocation3 + $0x60] sm:$0xff]  ;;  %658 = vmatpush.msra.mxu3 %v508_v32  ;;  %v413_v31 = vld [vmem:[#allocation3 + $0x98] sm:$0xff] }
  0x28   : > { %600 = vmatpush.msra.mxu0 %v408_v33  ;;  %v438_v38 = vld [vmem:[#allocation3 + $0x160] sm:$0xff]  ;;  %v472_v39 = vld [vmem:[#allocation3 + $0x270] sm:$0xff]  ;;  %620 = vmatpush.msra.mxu1 %v440_v34  ;;  %v445_v32 = vld [vmem:[#allocation3 + $0x198] sm:$0xff]  ;;  %p1082_p8 = pnand %p1081_p7, %p1077_p2 }
  0x29   : > { %639 = vmatpush.msra.mxu2 %v474_v35  ;;  %v504_v40 = vld [vmem:[#allocation3 + $0x370] sm:$0xff]  ;;  %659 = vmatpush.msra.mxu3 %v506_v36  ;;  %v470_v43 = vld [vmem:[#allocation3 + $0x260] sm:$0xff]  ;;  %v411_v35 = vld [vmem:[#allocation3 + $0x88] sm:$0xff] }
  0x2a   : > { %v404_v41 = vld [vmem:[#allocation3 + $0x50] sm:$0xff]  ;;  %601 = vmatpush.msra.mxu0 %v406_v37  ;;  %621 = vmatpush.msra.mxu1 %v438_v38  ;;  %v502_v44 = vld [vmem:[#allocation3 + $0x360] sm:$0xff]  ;;  %v443_v36 = vld [vmem:[#allocation3 + $0x188] sm:$0xff] }
  0x2b   : > { %v436_v42 = vld [vmem:[#allocation3 + $0x150] sm:$0xff]  ;;  %640 = vmatpush.msra.mxu2 %v472_v39  ;;  %v402_v45 = vld [vmem:[#allocation3 + $0x40] sm:$0xff]  ;;  %660 = vmatpush.msra.mxu3 %v504_v40  ;;  %v409_v39 = vld [vmem:[#allocation3 + $0x78] sm:$0xff] }
  0x2c   : > { %602 = vmatpush.msra.mxu0 %v404_v41  ;;  %v434_v46 = vld [vmem:[#allocation3 + $0x140] sm:$0xff]  ;;  %v468_v47 = vld [vmem:[#allocation3 + $0x250] sm:$0xff]  ;;  %622 = vmatpush.msra.mxu1 %v436_v42  ;;  %v441_v40 = vld [vmem:[#allocation3 + $0x178] sm:$0xff] }
  0x2d   : > { %641 = vmatpush.msra.mxu2 %v470_v43  ;;  %v500_v48 = vld [vmem:[#allocation3 + $0x350] sm:$0xff]  ;;  %661 = vmatpush.msra.mxu3 %v502_v44  ;;  %v466_v51 = vld [vmem:[#allocation3 + $0x240] sm:$0xff]  ;;  %v407_v43 = vld [vmem:[#allocation3 + $0x68] sm:$0xff] }
  0x2e   : > { %v400_v49 = vld [vmem:[#allocation3 + $0x30] sm:$0xff]  ;;  %603 = vmatpush.msra.mxu0 %v402_v45  ;;  %623 = vmatpush.msra.mxu1 %v434_v46  ;;  %v498_v52 = vld [vmem:[#allocation3 + $0x340] sm:$0xff]  ;;  %v439_v44 = vld [vmem:[#allocation3 + $0x168] sm:$0xff] }
  0x2f   : > { %v432_v50 = vld [vmem:[#allocation3 + $0x130] sm:$0xff]  ;;  %642 = vmatpush.msra.mxu2 %v468_v47  ;;  %v398_v53 = vld [vmem:[#allocation3 + $0x20] sm:$0xff]  ;;  %662 = vmatpush.msra.mxu3 %v500_v48  ;;  %v405_v47 = vld [vmem:[#allocation3 + $0x58] sm:$0xff] }
  0x30   : > { %604 = vmatpush.msra.mxu0 %v400_v49  ;;  %v430_v54 = vld [vmem:[#allocation3 + $0x120] sm:$0xff]  ;;  %v464_v55 = vld [vmem:[#allocation3 + $0x230] sm:$0xff]  ;;  %624 = vmatpush.msra.mxu1 %v432_v50  ;;  %v437_v48 = vld [vmem:[#allocation3 + $0x158] sm:$0xff] }
  0x31   : > { %643 = vmatpush.msra.mxu2 %v466_v51  ;;  %v496_v56 = vld [vmem:[#allocation3 + $0x330] sm:$0xff]  ;;  %663 = vmatpush.msra.mxu3 %v498_v52  ;;  %v462_v59 = vld [vmem:[#allocation3 + $0x220] sm:$0xff]  ;;  %v403_v51 = vld [vmem:[#allocation3 + $0x48] sm:$0xff]  ;;  %v1130_v52 = vmov 0.0  }
  0x32   : > { %v396_v57 = vld [vmem:[#allocation3 + $0x10] sm:$0xff]  ;;  %605 = vmatpush.msra.mxu0 %v398_v53  ;;  %625 = vmatpush.msra.mxu1 %v430_v54  ;;  %v494_v60 = vld [vmem:[#allocation3 + $0x320] sm:$0xff]  ;;  %344 = vst [vmem:[#allocation2 + $0x10] sm:$0x3] %v1130_v52  ;;  %v435_v53 = vld [vmem:[#allocation3 + $0x148] sm:$0xff] }
  0x33   : > { %v428_v58 = vld [vmem:[#allocation3 + $0x110] sm:$0xff]  ;;  %644 = vmatpush.msra.mxu2 %v464_v55  ;;  %v394_v61 = vld [vmem:[#allocation3] sm:$0xff]  ;;  %664 = vmatpush.msra.mxu3 %v496_v56  ;;  %345 = vst [vmem:[#allocation2] sm:$0x3] %v1130_v52  ;;  %v401_v56 = vld [vmem:[#allocation3 + $0x38] sm:$0xff] }
  0x34   : > { %606 = vmatpush.msra.mxu0 %v396_v57  ;;  %v426_v62 = vld [vmem:[#allocation3 + $0x100] sm:$0xff]  ;;  %v460_v63 = vld [vmem:[#allocation3 + $0x210] sm:$0xff]  ;;  %626 = vmatpush.msra.mxu1 %v428_v58  ;;  %v433_v57 = vld [vmem:[#allocation3 + $0x138] sm:$0xff]  ;;  %346 = vst [vmem:[#allocation2 + $0x18] sm:$0xc] %v1130_v52 }
  0x35   : > { %645 = vmatpush.msra.mxu2 %v462_v59  ;;  %v492_v0 = vld [vmem:[#allocation3 + $0x310] sm:$0xff]  ;;  %665 = vmatpush.msra.mxu3 %v494_v60  ;;  %v458_v3 = vld [vmem:[#allocation3 + $0x200] sm:$0xff]  ;;  %v399_v60 = vld [vmem:[#allocation3 + $0x28] sm:$0xff]  ;;  %347 = vst [vmem:[#allocation2 + $0x8] sm:$0xc] %v1130_v52 }
  0x36   : > { %v552_v1 = vld [vmem:[#allocation3 + $0x4f0] sm:$0xff]  ;;  %607 = vmatpush.msra.mxu0 %v394_v61  ;;  %627 = vmatpush.msra.mxu1 %v426_v62  ;;  %v490_v4 = vld [vmem:[#allocation3 + $0x300] sm:$0xff]  ;;  %v431_v61 = vld [vmem:[#allocation3 + $0x128] sm:$0xff] }
  0x37   : > { %v584_v2 = vld [vmem:[#allocation3 + $0x5f0] sm:$0xff]  ;;  %646 = vmatpush.msra.mxu2 %v460_v63  ;;  %v550_v5 = vld [vmem:[#allocation3 + $0x4e0] sm:$0xff]  ;;  %666 = vmatpush.msra.mxu3 %v492_v0 }
  0x38   : > { %672 = vmatpush.msrb.mxu0 %v552_v1  ;;  %v582_v6 = vld [vmem:[#allocation3 + $0x5e0] sm:$0xff]  ;;  %692 = vmatpush.msrb.mxu1 %v584_v2  ;;  %v548_v9 = vld [vmem:[#allocation3 + $0x4d0] sm:$0xff]  ;;  %v397_v1 = vld [vmem:[#allocation3 + $0x18] sm:$0xff] }
  0x39   : > { %647 = vmatpush.msra.mxu2 %v458_v3  ;;  %667 = vmatpush.msra.mxu3 %v490_v4  ;;  %v580_v10 = vld [vmem:[#allocation3 + $0x5d0] sm:$0xff]  ;;  %v546_v13 = vld [vmem:[#allocation3 + $0x4c0] sm:$0xff]  ;;  %v429_v2 = vld [vmem:[#allocation3 + $0x118] sm:$0xff] }
  0x3a   : > { %673 = vmatpush.msrb.mxu0 %v550_v5  ;;  %693 = vmatpush.msrb.mxu1 %v582_v6  ;;  %v578_v14 = vld [vmem:[#allocation3 + $0x5c0] sm:$0xff]  ;;  %v544_v17 = vld [vmem:[#allocation3 + $0x4b0] sm:$0xff]  ;;  %v395_v3 = vld [vmem:[#allocation3 + $0x8] sm:$0xff] }
  0x3b   : > { %712 = vmatpush.msrb.mxu2 %v425_v7  ;;  %732 = vmatpush.msrb.mxu3 %v457_v8  ;;  %v576_v18 = vld [vmem:[#allocation3 + $0x5b0] sm:$0xff]  ;;  %v542_v21 = vld [vmem:[#allocation3 + $0x4a0] sm:$0xff]  ;;  %v427_v4 = vld [vmem:[#allocation3 + $0x108] sm:$0xff] }
  0x3c   : > { %674 = vmatpush.msrb.mxu0 %v548_v9  ;;  %694 = vmatpush.msrb.mxu1 %v580_v10  ;;  %v574_v22 = vld [vmem:[#allocation3 + $0x5a0] sm:$0xff]  ;;  %v540_v25 = vld [vmem:[#allocation3 + $0x490] sm:$0xff]  ;;  %v313_v8 = vld [vmem:[%s296_s10 + $0x8] sm:$0xff] }
  0x3d   : > { %713 = vmatpush.msrb.mxu2 %v423_v11  ;;  %733 = vmatpush.msrb.mxu3 %v455_v12  ;;  %v572_v26 = vld [vmem:[#allocation3 + $0x590] sm:$0xff]  ;;  %v538_v29 = vld [vmem:[#allocation3 + $0x480] sm:$0xff] }
  0x3e   : > { %675 = vmatpush.msrb.mxu0 %v546_v13  ;;  %695 = vmatpush.msrb.mxu1 %v578_v14  ;;  %v570_v30 = vld [vmem:[#allocation3 + $0x580] sm:$0xff]  ;;  %v536_v33 = vld [vmem:[#allocation3 + $0x470] sm:$0xff] }
  0x3f   : > { %714 = vmatpush.msrb.mxu2 %v421_v15  ;;  %734 = vmatpush.msrb.mxu3 %v453_v16  ;;  %v568_v34 = vld [vmem:[#allocation3 + $0x570] sm:$0xff]  ;;  %v534_v37 = vld [vmem:[#allocation3 + $0x460] sm:$0xff] }
  0x40   : > { %676 = vmatpush.msrb.mxu0 %v544_v17  ;;  %696 = vmatpush.msrb.mxu1 %v576_v18  ;;  %v566_v38 = vld [vmem:[#allocation3 + $0x560] sm:$0xff]  ;;  %v532_v41 = vld [vmem:[#allocation3 + $0x450] sm:$0xff] }
  0x41   : > { %715 = vmatpush.msrb.mxu2 %v419_v19  ;;  %735 = vmatpush.msrb.mxu3 %v451_v20  ;;  %v564_v42 = vld [vmem:[#allocation3 + $0x550] sm:$0xff]  ;;  %v530_v45 = vld [vmem:[#allocation3 + $0x440] sm:$0xff] }
  0x42   : > { %677 = vmatpush.msrb.mxu0 %v542_v21  ;;  %697 = vmatpush.msrb.mxu1 %v574_v22  ;;  %v562_v46 = vld [vmem:[#allocation3 + $0x540] sm:$0xff]  ;;  %v528_v49 = vld [vmem:[#allocation3 + $0x430] sm:$0xff] }
  0x43   : > { %716 = vmatpush.msrb.mxu2 %v417_v23  ;;  %736 = vmatpush.msrb.mxu3 %v449_v24  ;;  %v560_v50 = vld [vmem:[#allocation3 + $0x530] sm:$0xff]  ;;  %v526_v54 = vld [vmem:[#allocation3 + $0x420] sm:$0xff] }
  0x44   : > { %678 = vmatpush.msrb.mxu0 %v540_v25  ;;  %698 = vmatpush.msrb.mxu1 %v572_v26  ;;  %v558_v55 = vld [vmem:[#allocation3 + $0x520] sm:$0xff]  ;;  %v524_v58 = vld [vmem:[#allocation3 + $0x410] sm:$0xff]  ;;  %v489_v26 = vld [vmem:[#allocation3 + $0x2f8] sm:$0xff] }
  0x45   : > { %717 = vmatpush.msrb.mxu2 %v415_v27  ;;  %737 = vmatpush.msrb.mxu3 %v447_v28  ;;  %v556_v59 = vld [vmem:[#allocation3 + $0x510] sm:$0xff]  ;;  %v522_v62 = vld [vmem:[#allocation3 + $0x400] sm:$0xff]  ;;  %v521_v27 = vld [vmem:[#allocation3 + $0x3f8] sm:$0xff] }
  0x46   : > { %679 = vmatpush.msrb.mxu0 %v538_v29  ;;  %699 = vmatpush.msrb.mxu1 %v570_v30  ;;  %v554_v63 = vld [vmem:[#allocation3 + $0x500] sm:$0xff]  ;;  %v487_v29 = vld [vmem:[#allocation3 + $0x2e8] sm:$0xff] }
  0x47   : > { %718 = vmatpush.msrb.mxu2 %v413_v31  ;;  %738 = vmatpush.msrb.mxu3 %v445_v32  ;;  %v307_v0 = vld [vmem:[%s1314_s1] ss:$2 sm:$0x3]  ;;  %v963_v9 = vld [vmem:[%s1314_s1 + $0x1] ss:$2 sm:$0x3] }
  0x48   : > { %680 = vmatpush.msrb.mxu0 %v536_v33  ;;  %700 = vmatpush.msrb.mxu1 %v568_v34  ;;  %v315_v5 = vperm.slane %v307_v0, 0  ;;  %v316_v6 = vperm.slane %v307_v0, 1  ;;  %v312_v7 = vld [vmem:[%s296_s10] sm:$0xff]  ;;  %v322_v12 = vperm.slane %v963_v9, 0  ;;  %v323_v13 = vperm.slane %v963_v9, 1  ;;  %v519_v32 = vld [vmem:[#allocation3 + $0x3e8] sm:$0xff] }
  0x49   : > { %719 = vmatpush.msrb.mxu2 %v411_v35  ;;  %739 = vmatpush.msrb.mxu3 %v443_v36  ;;  %v547_v0 = vld [vmem:[#allocation3 + $0x4c8] sm:$0xff]  ;;  %s852_s10 = sshll.u32 %s291_s26, 4  ;;  %s853_s10 = int_to_ptr.vmem [resolvable:$true] %s852_s10 }
  0x4a   : > { %681 = vmatpush.msrb.mxu0 %v534_v37  ;;  %701 = vmatpush.msrb.mxu1 %v566_v38  ;;  %v319_v10 = vmul.f32 %v315_v5, %v312_v7  ;;  %v320_v11 = vmul.f32 %v316_v6, %v313_v8  ;;  %v577_v5 = vld [vmem:[#allocation3 + $0x5b8] sm:$0xff]  ;;  %v543_v8 = vld [vmem:[#allocation3 + $0x4a8] sm:$0xff] }
  0x4b   : > { %720 = vmatpush.msrb.mxu2 %v409_v39  ;;  %740 = vmatpush.msrb.mxu3 %v441_v40  ;;  %v485_v40 = vld [vmem:[#allocation3 + $0x2d8] sm:$0xff]  ;;  %v575_v9 = vld [vmem:[#allocation3 + $0x5a8] sm:$0xff] }
  0x4c   : > { %682 = vmatpush.msrb.mxu0 %v532_v41  ;;  %702 = vmatpush.msrb.mxu1 %v564_v42  ;;  %v326_v15 = vadd.f32 %v322_v12, %v319_v10  ;;  %v327_v16 = vadd.f32 %v323_v13, %v320_v11  ;;  %v477_v6 = vld [vmem:[#allocation3 + $0x298] sm:$0xff]  ;;  %v475_v10 = vld [vmem:[#allocation3 + $0x288] sm:$0xff] }
  0x4d   : > { %721 = vmatpush.msrb.mxu2 %v407_v43  ;;  %741 = vmatpush.msrb.mxu3 %v439_v44  ;;  %v553_v43 = vld [vmem:[#allocation3 + $0x4f8] sm:$0xff]  ;;  %v507_v11 = vld [vmem:[#allocation3 + $0x388] sm:$0xff] }
  0x4e   : > { %683 = vmatpush.msrb.mxu0 %v530_v45  ;;  %703 = vmatpush.msrb.mxu1 %v562_v46  ;;  %v509_v7 = vld [vmem:[#allocation3 + $0x398] sm:$0xff] }
  0x4f   : > { %722 = vmatpush.msrb.mxu2 %v405_v47  ;;  %742 = vmatpush.msrb.mxu3 %v437_v48  ;;  %v585_v47 = vld [vmem:[#allocation3 + $0x5f8] sm:$0xff] }
  0x50   : > { %684 = vmatpush.msrb.mxu0 %v528_v49  ;;  %704 = vmatpush.msrb.mxu1 %v560_v50  ;;  %v517_v48 = vld [vmem:[#allocation3 + $0x3d8] sm:$0xff]  ;;  %v551_v50 = vld [vmem:[#allocation3 + $0x4e8] sm:$0xff] }
  0x51   : > { %723 = vmatpush.msrb.mxu2 %v403_v51  ;;  %743 = vmatpush.msrb.mxu3 %v435_v53  ;;  %v483_v51 = vld [vmem:[#allocation3 + $0x2c8] sm:$0xff]  ;;  %v541_v12 = vld [vmem:[#allocation3 + $0x498] sm:$0xff] }
  0x52   : > { %685 = vmatpush.msrb.mxu0 %v526_v54  ;;  %705 = vmatpush.msrb.mxu1 %v558_v55  ;;  %v583_v54 = vld [vmem:[#allocation3 + $0x5e8] sm:$0xff]  ;;  %v573_v13 = vld [vmem:[#allocation3 + $0x598] sm:$0xff] }
  0x53   : > { %724 = vmatpush.msrb.mxu2 %v401_v56  ;;  %744 = vmatpush.msrb.mxu3 %v433_v57  ;;  %v515_v55 = vld [vmem:[#allocation3 + $0x3c8] sm:$0xff] }
  0x54   : > { %686 = vmatpush.msrb.mxu0 %v524_v58  ;;  %706 = vmatpush.msrb.mxu1 %v556_v59  ;;  %v549_v58 = vld [vmem:[#allocation3 + $0x4d8] sm:$0xff] }
  0x55   : > { %725 = vmatpush.msrb.mxu2 %v399_v60  ;;  %745 = vmatpush.msrb.mxu3 %v431_v61  ;;  %v581_v59 = vld [vmem:[#allocation3 + $0x5d8] sm:$0xff] }
  0x56   : > { %687 = vmatpush.msrb.mxu0 %v522_v62  ;;  %707 = vmatpush.msrb.mxu1 %v554_v63  ;;  %v481_v61 = vld [vmem:[#allocation3 + $0x2b8] sm:$0xff] }
  0x57   : > { %726 = vmatpush.msrb.mxu2 %v397_v1  ;;  %746 = vmatpush.msrb.mxu3 %v429_v2  ;;  %v513_v62 = vld [vmem:[#allocation3 + $0x3b8] sm:$0xff]  ;;  %v579_v1 = vld [vmem:[#allocation3 + $0x5c8] sm:$0xff] }
  0x58   : > { %v479_v2 = vld [vmem:[#allocation3 + $0x2a8] sm:$0xff] }
  0x59   : > { %727 = vmatpush.msrb.mxu2 %v395_v3  ;;  %747 = vmatpush.msrb.mxu3 %v427_v4  ;;  %v511_v3 = vld [vmem:[#allocation3 + $0x3a8] sm:$0xff]  ;;  %v545_v4 = vld [vmem:[#allocation3 + $0x4b8] sm:$0xff] }
  0x8f   : > { %v331_v14 = vpop.permute.xlu0 %330 }
  0x90   : > { %v333_v17 = vmul.f32 %v331_v14, %v326_v15  ;;  %v334_v18 = vmul.f32 %v331_v14, %v327_v16  ;;  %v473_v14 = vld [vmem:[#allocation3 + $0x278] sm:$0xff]  ;;  %v539_v16 = vld [vmem:[#allocation3 + $0x488] sm:$0xff] }
  0x91   : > { %v505_v15 = vld [vmem:[#allocation3 + $0x378] sm:$0xff] }
  0x97   : > { %v338_v19 = vpop.permute.xlu0 %337 }
  0x98   : > { %v340_v20 = vadd.f32 %v338_v19, %v333_v17  ;;  %v341_v21 = vadd.f32 %v338_v19, %v334_v18  ;;  %v571_v17 = vld [vmem:[#allocation3 + $0x588] sm:$0xff] }
  0x99   : > { %v471_v18 = vld [vmem:[#allocation3 + $0x268] sm:$0xff] }
  0x9a   : > { %v342_v22 = vmax.f32 %v340_v20, 0.0  ;;  %v343_v23 = vmax.f32 %v341_v21, 0.0  ;;  %v503_v19 = vld [vmem:[#allocation3 + $0x368] sm:$0xff]  ;;  %v537_v20 = vld [vmem:[#allocation3 + $0x478] sm:$0xff] }
  0x9b   : > { %v569_v21 = vld [vmem:[#allocation3 + $0x578] sm:$0xff] }
  0x9c   : > { %v350_v24 = vrot.slane %v342_v22, 6  ;;  %v351_v25 = vrot.slane %v343_v23, 6  ;;  %v469_v22 = vld [vmem:[#allocation3 + $0x258] sm:$0xff] }
  0x9d   : > { %v501_v23 = vld [vmem:[#allocation3 + $0x358] sm:$0xff] }
  0x9e   : > { %354 = vst [vmem:[#allocation2 + $0x10] sm:$0xfc] %v350_v24 }
  0x9f   : > { %355 = vst [vmem:[#allocation2] sm:$0xfc] %v351_v25 }
  0xa0   : > { %356 = vst [vmem:[#allocation2 + $0x18] sm:$0x3] %v350_v24  ;;  %v535_v24 = vld [vmem:[#allocation3 + $0x468] sm:$0xff] }
  0xa1   : > { %357 = vst [vmem:[#allocation2 + $0x8] sm:$0x3] %v351_v25  ;;  %v567_v25 = vld [vmem:[#allocation3 + $0x568] sm:$0xff] }
  0xa5   : > { %v1242_v28 = vld [vmem:[#allocation2 + $0x10] sm:$0xff] }
  0xa6   : > { %v360_v30 = vld [vmem:[#allocation2 + $0x10] sm:$0xfc]  ;;  %608 = vmatmul.f32.vlgmr.msra.gmra.mxu0 %v1242_v28  ;;  %v1245_v31 = vld [vmem:[#allocation2] sm:$0xff] }
  0xa7   : > { %v373_v33 = vrot.slane %v360_v30, 2  ;;  %v361_v34 = vld [vmem:[#allocation2] sm:$0xfc]  ;;  %628 = vmatmul.f32.vlgmr.msra.gmra.mxu1 %v1245_v31  ;;  %752 = vmatpush.msra.mxu0 %v489_v26  ;;  %v362_v35 = vld [vmem:[#allocation2 + $0x18] sm:$0x3]  ;;  %v467_v26 = vld [vmem:[#allocation3 + $0x248] sm:$0xff] }
  0xa8   : > { %v376_v36 = vrot.slane %v361_v34, 2  ;;  %v364_v37 = vld [vmem:[#allocation2 + $0x10] sm:$0xf0]  ;;  %772 = vmatpush.msra.mxu1 %v521_v27  ;;  %v374_v38 = vrot.slane %v362_v35, 2  ;;  %v363_v39 = vld [vmem:[#allocation2 + $0x8] sm:$0x3] }
  0xa9   : > { %v366_v41 = vld [vmem:[#allocation2 + $0x18] sm:$0xf]  ;;  %753 = vmatpush.msra.mxu0 %v487_v29  ;;  %v377_v42 = vrot.slane %v363_v39, 2  ;;  %v365_v44 = vld [vmem:[#allocation2] sm:$0xf0]  ;;  %v386_v52 = vrot.slane %v364_v37, 4 }
  0xaa   : > { %v367_v45 = vld [vmem:[#allocation2 + $0x8] sm:$0xf]  ;;  %773 = vmatpush.msra.mxu1 %v519_v32  ;;  %v1249_v46 = vsel %vm372_vm0, %v373_v33, %v374_v38  ;;  %v387_v53 = vrot.slane %v366_v41, 4  ;;  %v389_v56 = vrot.slane %v365_v44, 4  ;;  %v565_v29 = vld [vmem:[#allocation3 + $0x558] sm:$0xff] }
  0xab   : > { %648 = vmatmul.f32.vlgmr.msra.gmra.mxu2 %v1249_v46  ;;  %v1253_v49 = vsel %vm372_vm0, %v376_v36, %v377_v42  ;;  %754 = vmatpush.msra.mxu0 %v485_v40  ;;  %v390_v57 = vrot.slane %v367_v45, 4  ;;  %v499_v27 = vld [vmem:[#allocation3 + $0x348] sm:$0xff]  ;;  %v465_v30 = vld [vmem:[#allocation3 + $0x238] sm:$0xff] }
  0xac   : > { %668 = vmatmul.f32.vlgmr.msra.gmra.mxu3 %v1253_v49  ;;  %792 = vmatpush.msra.mxu2 %v553_v43  ;;  %v1257_v60 = vsel %vm385_vm1, %v386_v52, %v387_v53  ;;  %v531_v32 = vld [vmem:[#allocation3 + $0x448] sm:$0xff]  ;;  %v529_v36 = vld [vmem:[#allocation3 + $0x438] sm:$0xff] }
  0xad   : > { %812 = vmatpush.msra.mxu3 %v585_v47  ;;  %774 = vmatpush.msra.mxu1 %v517_v48  ;;  %v1261_v63 = vsel %vm385_vm1, %v389_v56, %v390_v57  ;;  %v563_v33 = vld [vmem:[#allocation3 + $0x548] sm:$0xff]  ;;  %v561_v37 = vld [vmem:[#allocation3 + $0x538] sm:$0xff] }
  0xae   : > { %793 = vmatpush.msra.mxu2 %v551_v50  ;;  %755 = vmatpush.msra.mxu0 %v483_v51  ;;  %v463_v34 = vld [vmem:[#allocation3 + $0x228] sm:$0xff]  ;;  %v461_v38 = vld [vmem:[#allocation3 + $0x218] sm:$0xff]  ;;  %v586_v50 = vld [vmem:[%s1317_s4] sm:$0x3] }
  0xaf   : > { %813 = vmatpush.msra.mxu3 %v583_v54  ;;  %775 = vmatpush.msra.mxu1 %v515_v55  ;;  %v495_v35 = vld [vmem:[#allocation3 + $0x328] sm:$0xff]  ;;  %v493_v39 = vld [vmem:[#allocation3 + $0x318] sm:$0xff] }
  0xb0   : > { %794 = vmatpush.msra.mxu2 %v549_v58  ;;  %688 = vmatmul.f32.vlgmr.msrb.gmra.mxu0 %v1257_v60  ;;  %v527_v40 = vld [vmem:[#allocation3 + $0x428] sm:$0xff]  ;;  %v525_v44 = vld [vmem:[#allocation3 + $0x418] sm:$0xff] }
  0xb1   : > { %814 = vmatpush.msra.mxu3 %v581_v59  ;;  %708 = vmatmul.f32.vlgmr.msrb.gmra.mxu1 %v1261_v63  ;;  %v559_v41 = vld [vmem:[#allocation3 + $0x528] sm:$0xff]  ;;  %v557_v45 = vld [vmem:[#allocation3 + $0x518] sm:$0xff] }
  0xb2   : > { %756 = vmatpush.msra.mxu0 %v481_v61  ;;  %776 = vmatpush.msra.mxu1 %v513_v62  ;;  %v459_v42 = vld [vmem:[#allocation3 + $0x208] sm:$0xff]  ;;  %v832_v61 = vld [vmem:[%s306_s19] sm:$0xff] }
  0xb3   : > { %795 = vmatpush.msra.mxu2 %v547_v0  ;;  %815 = vmatpush.msra.mxu3 %v579_v1  ;;  %v491_v43 = vld [vmem:[#allocation3 + $0x308] sm:$0xff]  ;;  %v589_v0 = vperm.slane %v586_v50, 1 }
  0xb4   : > { %757 = vmatpush.msra.mxu0 %v479_v2  ;;  %777 = vmatpush.msra.mxu1 %v511_v3  ;;  %v523_v47 = vld [vmem:[#allocation3 + $0x408] sm:$0xff] }
  0xb5   : > { %728 = vmatmul.f32.vlgmr.msrb.gmra.mxu2 %v1242_v28  ;;  %748 = vmatmul.f32.vlgmr.msrb.gmra.mxu3 %v1245_v31  ;;  %v533_v28 = vld [vmem:[#allocation3 + $0x458] sm:$0xff]  ;;  %v555_v48 = vld [vmem:[#allocation3 + $0x508] sm:$0xff] }
  0xb6   : > { %796 = vmatpush.msra.mxu2 %v545_v4  ;;  %816 = vmatpush.msra.mxu3 %v577_v5  ;;  %v497_v31 = vld [vmem:[#allocation3 + $0x338] sm:$0xff] }
  0xb7   : > { %758 = vmatpush.msra.mxu0 %v477_v6  ;;  %778 = vmatpush.msra.mxu1 %v509_v7 }
  0xb8   : > { %797 = vmatpush.msra.mxu2 %v543_v8  ;;  %817 = vmatpush.msra.mxu3 %v575_v9 }
  0xb9   : > { %759 = vmatpush.msra.mxu0 %v475_v10  ;;  %779 = vmatpush.msra.mxu1 %v507_v11 }
  0xba   : > { %798 = vmatpush.msra.mxu2 %v541_v12  ;;  %818 = vmatpush.msra.mxu3 %v573_v13  ;;  %v833_v12 = vld [vmem:[%s306_s19 + $0x8] sm:$0xff] }
  0xbb   : > { %760 = vmatpush.msra.mxu0 %v473_v14  ;;  %780 = vmatpush.msra.mxu1 %v505_v15 }
  0xbc   : > { %799 = vmatpush.msra.mxu2 %v539_v16  ;;  %819 = vmatpush.msra.mxu3 %v571_v17 }
  0xbd   : > { %761 = vmatpush.msra.mxu0 %v471_v18  ;;  %781 = vmatpush.msra.mxu1 %v503_v19 }
  0xbe   : > { %800 = vmatpush.msra.mxu2 %v537_v20  ;;  %820 = vmatpush.msra.mxu3 %v569_v21 }
  0xbf   : > { %762 = vmatpush.msra.mxu0 %v469_v22  ;;  %782 = vmatpush.msra.mxu1 %v501_v23 }
  0xc0   : > { %801 = vmatpush.msra.mxu2 %v535_v24  ;;  %821 = vmatpush.msra.mxu3 %v567_v25 }
  0xc1   : > { %763 = vmatpush.msra.mxu0 %v467_v26  ;;  %783 = vmatpush.msra.mxu1 %v499_v27 }
  0xc2   : > { %802 = vmatpush.msra.mxu2 %v533_v28  ;;  %822 = vmatpush.msra.mxu3 %v565_v29 }
  0xc3   : > { %764 = vmatpush.msra.mxu0 %v465_v30  ;;  %784 = vmatpush.msra.mxu1 %v497_v31 }
  0xc4   : > { %803 = vmatpush.msra.mxu2 %v531_v32  ;;  %823 = vmatpush.msra.mxu3 %v563_v33 }
  0xc5   : > { %765 = vmatpush.msra.mxu0 %v463_v34  ;;  %785 = vmatpush.msra.mxu1 %v495_v35 }
  0xc6   : > { %804 = vmatpush.msra.mxu2 %v529_v36  ;;  %824 = vmatpush.msra.mxu3 %v561_v37 }
  0xc7   : > { %766 = vmatpush.msra.mxu0 %v461_v38  ;;  %786 = vmatpush.msra.mxu1 %v493_v39 }
  0xc8   : > { %805 = vmatpush.msra.mxu2 %v527_v40  ;;  %825 = vmatpush.msra.mxu3 %v559_v41 }
  0xc9   : > { %767 = vmatpush.msra.mxu0 %v459_v42  ;;  %787 = vmatpush.msra.mxu1 %v491_v43 }
  0xca   : > { %768 = vmatmul.f32.vlgmr.msra.gmra.mxu0 %v1249_v46  ;;  %788 = vmatmul.f32.vlgmr.msra.gmra.mxu1 %v1253_v49  ;;  %v588_v46 = vperm.slane %v586_v50, 0 }
  0xcb   : > { %806 = vmatpush.msra.mxu2 %v525_v44  ;;  %826 = vmatpush.msra.mxu3 %v557_v45 }
  0xcd   : > { %807 = vmatpush.msra.mxu2 %v523_v47  ;;  %827 = vmatpush.msra.mxu3 %v555_v48 }
  0xce   : > { %808 = vmatmul.f32.vlgmr.msra.gmra.mxu2 %v1257_v60  ;;  %828 = vmatmul.f32.vlgmr.msra.gmra.mxu3 %v1261_v63 }
 0x123   : > { %v609_v51 = vpop.f32.mrf.mxu0 }
 0x124   : > { %v610_v49 = vadd.f32 %v609_v51, %v588_v46  ;;  %v629_v52 = vpop.f32.mrf.mxu1 }
 0x126   : > { %v630_v53 = vadd.f32 %v629_v52, %v610_v49 }
 0x12d   : > { %v689_v58 = vpop.f32.mrf.mxu0 }
 0x12e   : > { %v649_v54 = vpop.f32.mrf.mxu2  ;;  %v709_v60 = vpop.f32.mrf.mxu1 }
 0x12f   : > { %v650_v55 = vadd.f32 %v649_v54, %v630_v53  ;;  %v669_v56 = vpop.f32.mrf.mxu3 }
 0x131   : > { %v670_v57 = vadd.f32 %v669_v56, %v650_v55 }
 0x133   : > { %v690_v59 = vadd.f32 %v689_v58, %v670_v57 }
 0x135   : > { %v710_v62 = vadd.f32 %v709_v60, %v690_v59 }
 0x137   : > { %v834_v63 = vadd.f32 %v832_v61, %v710_v62 }
 0x138   : > { %v729_v1 = vpop.f32.mrf.mxu2  ;;  %v749_v3 = vpop.f32.mrf.mxu3 }
 0x139   : > { %836 = vst [vmem:[%s291_s26] sm:$0xff] %v834_v63  ;;  %v730_v2 = vadd.f32 %v729_v1, %v589_v0 }
 0x13b   : > { %v750_v5 = vadd.f32 %v749_v3, %v730_v2 }
 0x147   : > { %v769_v4 = vpop.f32.mrf.mxu0  ;;  %v789_v7 = vpop.f32.mrf.mxu1 }
 0x148   : > { %v770_v6 = vadd.f32 %v769_v4, %v750_v5 }
 0x14a   : > { %v790_v8 = vadd.f32 %v789_v7, %v770_v6 }
 0x151   : > { %v809_v9 = vpop.f32.mrf.mxu2  ;;  %v829_v11 = vpop.f32.mrf.mxu3 }
 0x152   : > { %v810_v10 = vadd.f32 %v809_v9, %v790_v8 }
 0x154   : > { %v830_v13 = vadd.f32 %v829_v11, %v810_v10 }
 0x156   : > { %v835_v14 = vadd.f32 %v833_v12, %v830_v13 }
 0x158   : > { %837 = vst [vmem:[%s291_s26 + $0x8] sm:$0xff] %v835_v14 }
 0x159   : > { %1085 = shalt.err (!%p1082_p8)
}
 0x15a   : > { %977 = dma.vmem_to_hbm [thread:$0]  (%p1204_p5), %s853_s10, 256, %s855_s11, %s839_s25  }
 0x15b PF: > { %p989_p9 = scmp.ge.s32.totalorder %s1124_s24, 2  ;;  %s866_s15 = sand.u32 1, %s1112_s21  }
 0x15c   : > { %s867_s26 = scalar_lea.sflag [#allocation5], %s866_s15 }
 0x15d   : > { %p984_p10 = pnand %p989_p9, %p1208_p6 }
 0x15f   : > { %p985_p11 = pneg %p984_p10 }
 0x161   : > { %1107 = dma.done.wait (%p985_p11), %s867_s26, 256  }
 0x162   : > { %1109 = vsyncadd (%p985_p11), %s867_s26, 4294967040  ;;  %p17_p12 = scmp.ge.s32.totalorder %s1191_s27, 4   ;;  %s1322_s21 = smov %s1116_s22 }
 0x163   : > { %s1323_s22 = smov %s1120_s23  ;;  %s1324_s23 = smov %s1202_s30 }
 0x164   : > { %s1325_s24 = smov %s1191_s27  ;;  %19 = sbr.rel (!%p17_p12) target bundleno = 4 (0x4), region = 91 }
 0x169   :  { %873 = vsyncpa [#allocation4], 1 }
 0x16a   :  { %875 = vsyncpa [#allocation4 + $0x1], 1 }
 0x16b   :  { %876 = vsyncpa [#allocation5], 1 }
 0x16c   :  { %878 = vsyncpa [#allocation5 + $0x1], 1 }

</bundles_post_ra>
